<compile_context>
chip_gen: v5e
topology: v5e:2x2
jax: 0.10.0
libtpu: 0.0.40
codegen_flags: <defaults>
</compile_context>

<pallas_src>
import functools
import math

import jax
import jax.numpy as jnp
from jax.experimental import pallas as pl
from jax.experimental.pallas import tpu as pltpu


def _layernorm(x, gamma, beta, eps=1e-5):
    mu = jnp.mean(x, axis=-1, keepdims=True)
    xc = x - mu
    var = jnp.mean(xc * xc, axis=-1, keepdims=True)
    inv = jax.lax.rsqrt(var + eps)
    return xc * inv * gamma + beta


def reason_mod_kernel(
    x_ref, pe_ref,
    wemb_ref, bemb_ref,
    wqkv_ref, bqkv_ref,
    wo_ref, bo_ref,
    g1_ref, b1n_ref,
    w1_ref, b1_ref, w2_ref, b2_ref,
    g2_ref, b2n_ref,
    out_ref, *, B, L, H, hd):
    D = H * hd

    # ---- embedding linear (bf16 MXU operands, f32 accumulate) + positional encoding ----
    x_bf = x_ref[...].astype(jnp.bfloat16)                              # (B*L, D)
    h2 = (jnp.dot(x_bf, wemb_ref[...], preferred_element_type=jnp.float32)
          + bemb_ref[...] + pe_ref[...])                                # (B*L, D) f32

    # ---- fused QKV projection: single (B*L, D) @ (D, 3D) matmul ----
    h_bf = h2.astype(jnp.bfloat16)
    qkv = (jnp.dot(h_bf, wqkv_ref[...], preferred_element_type=jnp.float32)
           + bqkv_ref[...])                                             # (B*L, 3D) f32
    scale = 1.0 / math.sqrt(hd)
    q_all = qkv[:, 0:D] * scale
    k_all = qkv[:, D:2 * D]
    v_all = qkv[:, 2 * D:3 * D]

    # ---- attention core: per head (H is tiny & static), batched over B, attends over L ----
    ctx_heads = []
    for h in range(H):
        cs = slice(h * hd, (h + 1) * hd)
        q3 = q_all[:, cs].reshape(B, L, hd)
        k3 = k_all[:, cs].reshape(B, L, hd)
        v3 = v_all[:, cs].reshape(B, L, hd)
        s = jnp.einsum('ble,bme->blm', q3, k3, preferred_element_type=jnp.float32)
        s = s - jnp.max(s, axis=-1, keepdims=True)
        p = jnp.exp(s)
        # approx reciprocal goes to the (otherwise idle) EUP slot instead of VALU divide
        p = p * pl.reciprocal(jnp.sum(p, axis=-1, keepdims=True), approx=True)
        ctx3 = jnp.einsum('blm,bme->ble', p, v3, preferred_element_type=jnp.float32)
        ctx_heads.append(ctx3.reshape(B * L, hd))
    ctx2 = jnp.concatenate(ctx_heads, axis=-1)                          # (B*L, D) f32

    # ---- fused output projection: single (D, D) matmul ----
    attn2 = (jnp.dot(ctx2.astype(jnp.bfloat16), wo_ref[...],
                     preferred_element_type=jnp.float32) + bo_ref[...])

    # ---- residual + LayerNorm1 (f32) ----
    n1 = _layernorm(h2 + attn2, g1_ref[...], b1n_ref[...])

    # ---- feed-forward (relu), bf16 MXU operands, f32 accumulate / elementwise ----
    ff = (jnp.dot(n1.astype(jnp.bfloat16), w1_ref[...],
                  preferred_element_type=jnp.float32) + b1_ref[...])
    ff = jnp.maximum(ff, 0.0)
    ff = (jnp.dot(ff.astype(jnp.bfloat16), w2_ref[...],
                  preferred_element_type=jnp.float32) + b2_ref[...])

    # ---- residual + LayerNorm2 ----
    n2 = _layernorm(n1 + ff, g2_ref[...], b2n_ref[...])

    # ---- MultiTurnTransformer outer residual: (emb+pe) + encoder(emb+pe) ----
    out_ref[...] = h2 + n2


def positional_encoding(seq_len, d_model):
    position = jnp.arange(seq_len, dtype=jnp.float32)[:, None]
    div_term = jnp.exp(jnp.arange(0, d_model, 2, dtype=jnp.float32)
                       * (-math.log(10000.0) / d_model))
    ang = position * div_term
    pe = jnp.zeros((seq_len, d_model), jnp.float32)
    pe = pe.at[:, 0::2].set(jnp.sin(ang))
    pe = pe.at[:, 1::2].set(jnp.cos(ang))
    return pe


def init_params(key, D, FF):
    """Fused-layout f32 parameters (torch-equivalent up to the QKV/head packing)."""
    ks = jax.random.split(key, 8)
    s = 0.05
    n = lambda k, shp: s * jax.random.normal(k, shp, jnp.float32)
    return dict(
        wemb=n(ks[0], (D, D)),       bemb=n(ks[1], (1, D)),
        wqkv=n(ks[2], (D, 3 * D)),   bqkv=n(ks[3], (1, 3 * D)),
        wo=n(ks[4], (D, D)),         bo=n(ks[5], (1, D)),
        g1=jnp.ones((1, D), jnp.float32),  b1n=jnp.zeros((1, D), jnp.float32),
        w1=n(ks[6], (D, FF)),        b1=jnp.zeros((1, FF), jnp.float32),
        w2=n(ks[7], (FF, D)),        b2=jnp.zeros((1, D), jnp.float32),
        g2=jnp.ones((1, D), jnp.float32),  b2n=jnp.zeros((1, D), jnp.float32),
    )


def prepare_kernel_constants(params, T0, T1):
    """One-time prep (hoisted out of the per-call path): bf16-cast MXU weights
    and bake the constant positional encoding broadcast to the kernel's
    (B*L, D) row layout, where B = torch dim-1 and L = torch dim-0."""
    D = params["wemb"].shape[0]
    B, L = T1, T0
    pe = positional_encoding(T1, D)                                    # pe indexed by torch dim-1
    pe_rows = jnp.broadcast_to(pe[:, None, :], (B, L, D)).reshape(B * L, D)
    bf = lambda w: w.astype(jnp.bfloat16)
    return (
        pe_rows,
        bf(params["wemb"]), params["bemb"],
        bf(params["wqkv"]), params["bqkv"],
        bf(params["wo"]), params["bo"],
        params["g1"], params["b1n"],
        bf(params["w1"]), params["b1"],
        bf(params["w2"]), params["b2"],
        params["g2"], params["b2n"],
    )


def reason_mod_forward(x, consts, nhead=4):
    """x: (T0, T1, D) in the PyTorch convention (attention over T0, pe over T1)."""
    T0, T1, D = x.shape
    B, L, H = T1, T0, nhead
    hd = D // H
    FF = consts[9].shape[1]                                            # w1 is (D, FF)
    N = B * L

    # Layout glue: kernel rows ordered (B, L) = (torch dim-1, dim-0), D on the lane axis.
    # TODO(synk): fold this transpose into the producer of context_buffer upstream.
    xk = jnp.transpose(x, (1, 0, 2)).reshape(N, D).astype(jnp.float32)
    args = (xk,) + consts

    flops = (2 * N * D * D              # embedding
             + 2 * N * D * 3 * D        # fused QKV projection
             + 4 * B * H * L * L * hd   # scores + PV
             + 2 * N * D * D            # output projection
             + 4 * N * D * FF)          # feed-forward
    bytes_accessed = sum(int(a.size) * a.dtype.itemsize for a in args) + N * D * 4
    cost = pl.CostEstimate(flops=flops,
                           transcendentals=B * H * L * L,
                           bytes_accessed=bytes_accessed)

    kernel = functools.partial(reason_mod_kernel, B=B, L=L, H=H, hd=hd)
    vmem = pl.BlockSpec(memory_space=pltpu.MemorySpace.VMEM)

    out2 = pl.pallas_call(
        kernel,
        out_shape=jax.ShapeDtypeStruct((N, D), jnp.float32),
        in_specs=[vmem] * len(args),
        out_specs=vmem,
        cost_estimate=cost,
    )(*args)

    return jnp.transpose(out2.reshape(B, L, D), (1, 0, 2))             # back to (T0, T1, D)


if __name__ == "__main__":
    key = jax.random.PRNGKey(0)
    kx, kp = jax.random.split(key)

    # in_channels = 16 (must be divisible by nhead=4); context_buffer (T0=8, T1=2, D=16)
    T0, T1, D = 8, 2, 16
    H, FF = 4, 2048

    x = jax.random.normal(kx, (T0, T1, D), jnp.float32)
    params = init_params(kp, D, FF)
    consts = prepare_kernel_constants(params, T0, T1)   # hoisted: per-call invariant

    out = reason_mod_forward(x, consts, nhead=H)
    out = jax.block_until_ready(out)
    assert out.shape == (T0, T1, D)
    assert bool(jnp.all(jnp.isfinite(out)))
    print("KERNEL_OK")
</pallas_src>

<mosaic_0001>
module attributes {stable_mosaic.version = 11 : i64} {
  func.func @reason_mod_kernel(%arg0: memref<16x16xf32, #tpu.memory_space<vmem>>, %arg1: memref<16x16xf32, #tpu.memory_space<vmem>>, %arg2: memref<16x16xbf16, #tpu.memory_space<vmem>>, %arg3: memref<1x16xf32, #tpu.memory_space<vmem>>, %arg4: memref<16x48xbf16, #tpu.memory_space<vmem>>, %arg5: memref<1x48xf32, #tpu.memory_space<vmem>>, %arg6: memref<16x16xbf16, #tpu.memory_space<vmem>>, %arg7: memref<1x16xf32, #tpu.memory_space<vmem>>, %arg8: memref<1x16xf32, #tpu.memory_space<vmem>>, %arg9: memref<1x16xf32, #tpu.memory_space<vmem>>, %arg10: memref<16x2048xbf16, #tpu.memory_space<vmem>>, %arg11: memref<1x2048xf32, #tpu.memory_space<vmem>>, %arg12: memref<2048x16xbf16, #tpu.memory_space<vmem>>, %arg13: memref<1x16xf32, #tpu.memory_space<vmem>>, %arg14: memref<1x16xf32, #tpu.memory_space<vmem>>, %arg15: memref<1x16xf32, #tpu.memory_space<vmem>>, %arg16: memref<16x16xf32, #tpu.memory_space<vmem>>) attributes {dimension_semantics = [], scalar_prefetch = 0 : i64, scratch_operands = 0 : i64, tpu.core_type = #tpu.core_type<tc>} {
    %c0 = arith.constant 0 : index
    %c0_0 = arith.constant 0 : index
    %0 = vector.load %arg0[%c0, %c0_0] : memref<16x16xf32, #tpu.memory_space<vmem>>, vector<16x16xf32>
    %1 = arith.truncf %0 : vector<16x16xf32> to vector<16x16xbf16>
    %c0_1 = arith.constant 0 : index
    %c0_2 = arith.constant 0 : index
    %2 = vector.load %arg2[%c0_1, %c0_2] : memref<16x16xbf16, #tpu.memory_space<vmem>>, vector<16x16xbf16>
    %cst = arith.constant dense<0.000000e+00> : vector<16x16xf32>
    %3 = tpu.matmul %1, %2, %cst {dimension_numbers = #tpu.dot_dimension_numbers<[1], [0], [0], [1], [0, 0, 1, 1], [], []>} : vector<16x16xbf16>, vector<16x16xbf16>, vector<16x16xf32> -> vector<16x16xf32>
    %c0_3 = arith.constant 0 : index
    %c0_4 = arith.constant 0 : index
    %4 = vector.load %arg3[%c0_3, %c0_4] : memref<1x16xf32, #tpu.memory_space<vmem>>, vector<1x16xf32>
    %5 = vector.broadcast %4 : vector<1x16xf32> to vector<16x16xf32>
    %6 = arith.addf %3, %5 : vector<16x16xf32>
    %c0_5 = arith.constant 0 : index
    %c0_6 = arith.constant 0 : index
    %7 = vector.load %arg1[%c0_5, %c0_6] : memref<16x16xf32, #tpu.memory_space<vmem>>, vector<16x16xf32>
    %8 = arith.addf %6, %7 : vector<16x16xf32>
    %9 = arith.truncf %8 : vector<16x16xf32> to vector<16x16xbf16>
    %c0_7 = arith.constant 0 : index
    %c0_8 = arith.constant 0 : index
    %10 = vector.load %arg4[%c0_7, %c0_8] : memref<16x48xbf16, #tpu.memory_space<vmem>>, vector<16x48xbf16>
    %cst_9 = arith.constant dense<0.000000e+00> : vector<16x48xf32>
    %11 = tpu.matmul %9, %10, %cst_9 {dimension_numbers = #tpu.dot_dimension_numbers<[1], [0], [0], [1], [0, 0, 1, 1], [], []>} : vector<16x16xbf16>, vector<16x48xbf16>, vector<16x48xf32> -> vector<16x48xf32>
    %c0_10 = arith.constant 0 : index
    %c0_11 = arith.constant 0 : index
    %12 = vector.load %arg5[%c0_10, %c0_11] : memref<1x48xf32, #tpu.memory_space<vmem>>, vector<1x48xf32>
    %13 = vector.broadcast %12 : vector<1x48xf32> to vector<16x48xf32>
    %14 = arith.addf %11, %13 : vector<16x48xf32>
    %15 = vector.extract_strided_slice %14 {offsets = [0, 0], sizes = [16, 16], strides = [1, 1]} : vector<16x48xf32> to vector<16x16xf32>
    %cst_12 = arith.constant 5.000000e-01 : f32
    %16 = vector.broadcast %cst_12 : f32 to vector<16x16xf32>
    %17 = arith.mulf %15, %16 : vector<16x16xf32>
    %18 = vector.extract_strided_slice %14 {offsets = [0, 16], sizes = [16, 16], strides = [1, 1]} : vector<16x48xf32> to vector<16x16xf32>
    %19 = vector.extract_strided_slice %14 {offsets = [0, 32], sizes = [16, 16], strides = [1, 1]} : vector<16x48xf32> to vector<16x16xf32>
    %20 = vector.extract_strided_slice %17 {offsets = [0, 0], sizes = [16, 4], strides = [1, 1]} : vector<16x16xf32> to vector<16x4xf32>
    %21 = vector.shape_cast %20 : vector<16x4xf32> to vector<2x8x4xf32>
    %22 = vector.extract_strided_slice %18 {offsets = [0, 0], sizes = [16, 4], strides = [1, 1]} : vector<16x16xf32> to vector<16x4xf32>
    %23 = vector.shape_cast %22 : vector<16x4xf32> to vector<2x8x4xf32>
    %24 = vector.extract_strided_slice %19 {offsets = [0, 0], sizes = [16, 4], strides = [1, 1]} : vector<16x16xf32> to vector<16x4xf32>
    %25 = vector.shape_cast %24 : vector<16x4xf32> to vector<2x8x4xf32>
    "tpu.trace_start"() <{level = 10 : i32, message = "ble,bme->blm"}> : () -> ()
    %cst_13 = arith.constant dense<0.000000e+00> : vector<2x8x8xf32>
    %26 = tpu.matmul %21, %23, %cst_13 {dimension_numbers = #tpu.dot_dimension_numbers<[2], [2], [1], [1], [0, 0, 0, 1, 1, 1], [0], [0]>} : vector<2x8x4xf32>, vector<2x8x4xf32>, vector<2x8x8xf32> -> vector<2x8x8xf32>
    "tpu.trace_stop"() : () -> ()
    %cst_14 = arith.constant dense<0xFF800000> : vector<2x8xf32>
    %27 = vector.multi_reduction <maximumf>, %26, %cst_14 [2] : vector<2x8x8xf32> to vector<2x8xf32>
    %28 = vector.shape_cast %27 : vector<2x8xf32> to vector<2x8x1xf32>
    %29 = vector.broadcast %28 : vector<2x8x1xf32> to vector<2x8x8xf32>
    %30 = arith.subf %26, %29 : vector<2x8x8xf32>
    %31 = math.exp %30 : vector<2x8x8xf32>
    %cst_15 = arith.constant dense<0.000000e+00> : vector<2x8xf32>
    %32 = vector.multi_reduction <add>, %31, %cst_15 [2] : vector<2x8x8xf32> to vector<2x8xf32>
    %33 = vector.shape_cast %32 : vector<2x8xf32> to vector<2x8x1xf32>
    %34 = tpu.reciprocal %33 {approx = true} : vector<2x8x1xf32> -> vector<2x8x1xf32>
    %35 = vector.broadcast %34 : vector<2x8x1xf32> to vector<2x8x8xf32>
    %36 = arith.mulf %31, %35 : vector<2x8x8xf32>
    "tpu.trace_start"() <{level = 10 : i32, message = "blm,bme->ble"}> : () -> ()
    %cst_16 = arith.constant dense<0.000000e+00> : vector<2x8x4xf32>
    %37 = tpu.matmul %36, %25, %cst_16 {dimension_numbers = #tpu.dot_dimension_numbers<[2], [1], [1], [2], [0, 0, 0, 1, 1, 2], [0], [0]>} : vector<2x8x8xf32>, vector<2x8x4xf32>, vector<2x8x4xf32> -> vector<2x8x4xf32>
    "tpu.trace_stop"() : () -> ()
    %38 = vector.shape_cast %37 : vector<2x8x4xf32> to vector<16x4xf32>
    %39 = vector.extract_strided_slice %17 {offsets = [0, 4], sizes = [16, 4], strides = [1, 1]} : vector<16x16xf32> to vector<16x4xf32>
    %40 = vector.shape_cast %39 : vector<16x4xf32> to vector<2x8x4xf32>
    %41 = vector.extract_strided_slice %18 {offsets = [0, 4], sizes = [16, 4], strides = [1, 1]} : vector<16x16xf32> to vector<16x4xf32>
    %42 = vector.shape_cast %41 : vector<16x4xf32> to vector<2x8x4xf32>
    %43 = vector.extract_strided_slice %19 {offsets = [0, 4], sizes = [16, 4], strides = [1, 1]} : vector<16x16xf32> to vector<16x4xf32>
    %44 = vector.shape_cast %43 : vector<16x4xf32> to vector<2x8x4xf32>
    "tpu.trace_start"() <{level = 10 : i32, message = "ble,bme->blm"}> : () -> ()
    %cst_17 = arith.constant dense<0.000000e+00> : vector<2x8x8xf32>
    %45 = tpu.matmul %40, %42, %cst_17 {dimension_numbers = #tpu.dot_dimension_numbers<[2], [2], [1], [1], [0, 0, 0, 1, 1, 1], [0], [0]>} : vector<2x8x4xf32>, vector<2x8x4xf32>, vector<2x8x8xf32> -> vector<2x8x8xf32>
    "tpu.trace_stop"() : () -> ()
    %cst_18 = arith.constant dense<0xFF800000> : vector<2x8xf32>
    %46 = vector.multi_reduction <maximumf>, %45, %cst_18 [2] : vector<2x8x8xf32> to vector<2x8xf32>
    %47 = vector.shape_cast %46 : vector<2x8xf32> to vector<2x8x1xf32>
    %48 = vector.broadcast %47 : vector<2x8x1xf32> to vector<2x8x8xf32>
    %49 = arith.subf %45, %48 : vector<2x8x8xf32>
    %50 = math.exp %49 : vector<2x8x8xf32>
    %cst_19 = arith.constant dense<0.000000e+00> : vector<2x8xf32>
    %51 = vector.multi_reduction <add>, %50, %cst_19 [2] : vector<2x8x8xf32> to vector<2x8xf32>
    %52 = vector.shape_cast %51 : vector<2x8xf32> to vector<2x8x1xf32>
    %53 = tpu.reciprocal %52 {approx = true} : vector<2x8x1xf32> -> vector<2x8x1xf32>
    %54 = vector.broadcast %53 : vector<2x8x1xf32> to vector<2x8x8xf32>
    %55 = arith.mulf %50, %54 : vector<2x8x8xf32>
    "tpu.trace_start"() <{level = 10 : i32, message = "blm,bme->ble"}> : () -> ()
    %cst_20 = arith.constant dense<0.000000e+00> : vector<2x8x4xf32>
    %56 = tpu.matmul %55, %44, %cst_20 {dimension_numbers = #tpu.dot_dimension_numbers<[2], [1], [1], [2], [0, 0, 0, 1, 1, 2], [0], [0]>} : vector<2x8x8xf32>, vector<2x8x4xf32>, vector<2x8x4xf32> -> vector<2x8x4xf32>
    "tpu.trace_stop"() : () -> ()
    %57 = vector.shape_cast %56 : vector<2x8x4xf32> to vector<16x4xf32>
    %58 = vector.extract_strided_slice %17 {offsets = [0, 8], sizes = [16, 4], strides = [1, 1]} : vector<16x16xf32> to vector<16x4xf32>
    %59 = vector.shape_cast %58 : vector<16x4xf32> to vector<2x8x4xf32>
    %60 = vector.extract_strided_slice %18 {offsets = [0, 8], sizes = [16, 4], strides = [1, 1]} : vector<16x16xf32> to vector<16x4xf32>
    %61 = vector.shape_cast %60 : vector<16x4xf32> to vector<2x8x4xf32>
    %62 = vector.extract_strided_slice %19 {offsets = [0, 8], sizes = [16, 4], strides = [1, 1]} : vector<16x16xf32> to vector<16x4xf32>
    %63 = vector.shape_cast %62 : vector<16x4xf32> to vector<2x8x4xf32>
    "tpu.trace_start"() <{level = 10 : i32, message = "ble,bme->blm"}> : () -> ()
    %cst_21 = arith.constant dense<0.000000e+00> : vector<2x8x8xf32>
    %64 = tpu.matmul %59, %61, %cst_21 {dimension_numbers = #tpu.dot_dimension_numbers<[2], [2], [1], [1], [0, 0, 0, 1, 1, 1], [0], [0]>} : vector<2x8x4xf32>, vector<2x8x4xf32>, vector<2x8x8xf32> -> vector<2x8x8xf32>
    "tpu.trace_stop"() : () -> ()
    %cst_22 = arith.constant dense<0xFF800000> : vector<2x8xf32>
    %65 = vector.multi_reduction <maximumf>, %64, %cst_22 [2] : vector<2x8x8xf32> to vector<2x8xf32>
    %66 = vector.shape_cast %65 : vector<2x8xf32> to vector<2x8x1xf32>
    %67 = vector.broadcast %66 : vector<2x8x1xf32> to vector<2x8x8xf32>
    %68 = arith.subf %64, %67 : vector<2x8x8xf32>
    %69 = math.exp %68 : vector<2x8x8xf32>
    %cst_23 = arith.constant dense<0.000000e+00> : vector<2x8xf32>
    %70 = vector.multi_reduction <add>, %69, %cst_23 [2] : vector<2x8x8xf32> to vector<2x8xf32>
    %71 = vector.shape_cast %70 : vector<2x8xf32> to vector<2x8x1xf32>
    %72 = tpu.reciprocal %71 {approx = true} : vector<2x8x1xf32> -> vector<2x8x1xf32>
    %73 = vector.broadcast %72 : vector<2x8x1xf32> to vector<2x8x8xf32>
    %74 = arith.mulf %69, %73 : vector<2x8x8xf32>
    "tpu.trace_start"() <{level = 10 : i32, message = "blm,bme->ble"}> : () -> ()
    %cst_24 = arith.constant dense<0.000000e+00> : vector<2x8x4xf32>
    %75 = tpu.matmul %74, %63, %cst_24 {dimension_numbers = #tpu.dot_dimension_numbers<[2], [1], [1], [2], [0, 0, 0, 1, 1, 2], [0], [0]>} : vector<2x8x8xf32>, vector<2x8x4xf32>, vector<2x8x4xf32> -> vector<2x8x4xf32>
    "tpu.trace_stop"() : () -> ()
    %76 = vector.shape_cast %75 : vector<2x8x4xf32> to vector<16x4xf32>
    %77 = vector.extract_strided_slice %17 {offsets = [0, 12], sizes = [16, 4], strides = [1, 1]} : vector<16x16xf32> to vector<16x4xf32>
    %78 = vector.shape_cast %77 : vector<16x4xf32> to vector<2x8x4xf32>
    %79 = vector.extract_strided_slice %18 {offsets = [0, 12], sizes = [16, 4], strides = [1, 1]} : vector<16x16xf32> to vector<16x4xf32>
    %80 = vector.shape_cast %79 : vector<16x4xf32> to vector<2x8x4xf32>
    %81 = vector.extract_strided_slice %19 {offsets = [0, 12], sizes = [16, 4], strides = [1, 1]} : vector<16x16xf32> to vector<16x4xf32>
    %82 = vector.shape_cast %81 : vector<16x4xf32> to vector<2x8x4xf32>
    "tpu.trace_start"() <{level = 10 : i32, message = "ble,bme->blm"}> : () -> ()
    %cst_25 = arith.constant dense<0.000000e+00> : vector<2x8x8xf32>
    %83 = tpu.matmul %78, %80, %cst_25 {dimension_numbers = #tpu.dot_dimension_numbers<[2], [2], [1], [1], [0, 0, 0, 1, 1, 1], [0], [0]>} : vector<2x8x4xf32>, vector<2x8x4xf32>, vector<2x8x8xf32> -> vector<2x8x8xf32>
    "tpu.trace_stop"() : () -> ()
    %cst_26 = arith.constant dense<0xFF800000> : vector<2x8xf32>
    %84 = vector.multi_reduction <maximumf>, %83, %cst_26 [2] : vector<2x8x8xf32> to vector<2x8xf32>
    %85 = vector.shape_cast %84 : vector<2x8xf32> to vector<2x8x1xf32>
    %86 = vector.broadcast %85 : vector<2x8x1xf32> to vector<2x8x8xf32>
    %87 = arith.subf %83, %86 : vector<2x8x8xf32>
    %88 = math.exp %87 : vector<2x8x8xf32>
    %cst_27 = arith.constant dense<0.000000e+00> : vector<2x8xf32>
    %89 = vector.multi_reduction <add>, %88, %cst_27 [2] : vector<2x8x8xf32> to vector<2x8xf32>
    %90 = vector.shape_cast %89 : vector<2x8xf32> to vector<2x8x1xf32>
    %91 = tpu.reciprocal %90 {approx = true} : vector<2x8x1xf32> -> vector<2x8x1xf32>
    %92 = vector.broadcast %91 : vector<2x8x1xf32> to vector<2x8x8xf32>
    %93 = arith.mulf %88, %92 : vector<2x8x8xf32>
    "tpu.trace_start"() <{level = 10 : i32, message = "blm,bme->ble"}> : () -> ()
    %cst_28 = arith.constant dense<0.000000e+00> : vector<2x8x4xf32>
    %94 = tpu.matmul %93, %82, %cst_28 {dimension_numbers = #tpu.dot_dimension_numbers<[2], [1], [1], [2], [0, 0, 0, 1, 1, 2], [0], [0]>} : vector<2x8x8xf32>, vector<2x8x4xf32>, vector<2x8x4xf32> -> vector<2x8x4xf32>
    "tpu.trace_stop"() : () -> ()
    %95 = vector.shape_cast %94 : vector<2x8x4xf32> to vector<16x4xf32>
    %96 = tpu.concatenate %38, %57, %76, %95 in 1 : vector<16x4xf32>, vector<16x4xf32>, vector<16x4xf32>, vector<16x4xf32> -> vector<16x16xf32>
    %97 = arith.truncf %96 : vector<16x16xf32> to vector<16x16xbf16>
    %c0_29 = arith.constant 0 : index
    %c0_30 = arith.constant 0 : index
    %98 = vector.load %arg6[%c0_29, %c0_30] : memref<16x16xbf16, #tpu.memory_space<vmem>>, vector<16x16xbf16>
    %cst_31 = arith.constant dense<0.000000e+00> : vector<16x16xf32>
    %99 = tpu.matmul %97, %98, %cst_31 {dimension_numbers = #tpu.dot_dimension_numbers<[1], [0], [0], [1], [0, 0, 1, 1], [], []>} : vector<16x16xbf16>, vector<16x16xbf16>, vector<16x16xf32> -> vector<16x16xf32>
    %c0_32 = arith.constant 0 : index
    %c0_33 = arith.constant 0 : index
    %100 = vector.load %arg7[%c0_32, %c0_33] : memref<1x16xf32, #tpu.memory_space<vmem>>, vector<1x16xf32>
    %101 = vector.broadcast %100 : vector<1x16xf32> to vector<16x16xf32>
    %102 = arith.addf %99, %101 : vector<16x16xf32>
    %103 = arith.addf %8, %102 : vector<16x16xf32>
    %c0_34 = arith.constant 0 : index
    %c0_35 = arith.constant 0 : index
    %104 = vector.load %arg8[%c0_34, %c0_35] : memref<1x16xf32, #tpu.memory_space<vmem>>, vector<1x16xf32>
    %c0_36 = arith.constant 0 : index
    %c0_37 = arith.constant 0 : index
    %105 = vector.load %arg9[%c0_36, %c0_37] : memref<1x16xf32, #tpu.memory_space<vmem>>, vector<1x16xf32>
    %cst_38 = arith.constant dense<0.000000e+00> : vector<16xf32>
    %106 = vector.multi_reduction <add>, %103, %cst_38 [1] : vector<16x16xf32> to vector<16xf32>
    %107 = vector.shape_cast %106 : vector<16xf32> to vector<16x1xf32>
    %cst_39 = arith.constant 1.600000e+01 : f32
    %108 = vector.broadcast %cst_39 : f32 to vector<16x1xf32>
    %109 = arith.divf %107, %108 : vector<16x1xf32>
    %110 = vector.broadcast %109 : vector<16x1xf32> to vector<16x16xf32>
    %111 = arith.subf %103, %110 : vector<16x16xf32>
    %112 = arith.mulf %111, %111 : vector<16x16xf32>
    %cst_40 = arith.constant dense<0.000000e+00> : vector<16xf32>
    %113 = vector.multi_reduction <add>, %112, %cst_40 [1] : vector<16x16xf32> to vector<16xf32>
    %114 = vector.shape_cast %113 : vector<16xf32> to vector<16x1xf32>
    %cst_41 = arith.constant 1.600000e+01 : f32
    %115 = vector.broadcast %cst_41 : f32 to vector<16x1xf32>
    %116 = arith.divf %114, %115 : vector<16x1xf32>
    %cst_42 = arith.constant 9.99999974E-6 : f32
    %117 = vector.broadcast %cst_42 : f32 to vector<16x1xf32>
    %118 = arith.addf %116, %117 : vector<16x1xf32>
    %119 = math.rsqrt %118 : vector<16x1xf32>
    %120 = vector.broadcast %119 : vector<16x1xf32> to vector<16x16xf32>
    %121 = arith.mulf %111, %120 : vector<16x16xf32>
    %122 = vector.broadcast %104 : vector<1x16xf32> to vector<16x16xf32>
    %123 = arith.mulf %121, %122 : vector<16x16xf32>
    %124 = vector.broadcast %105 : vector<1x16xf32> to vector<16x16xf32>
    %125 = arith.addf %123, %124 : vector<16x16xf32>
    %126 = arith.truncf %125 : vector<16x16xf32> to vector<16x16xbf16>
    %c0_43 = arith.constant 0 : index
    %c0_44 = arith.constant 0 : index
    %127 = vector.load %arg10[%c0_43, %c0_44] : memref<16x2048xbf16, #tpu.memory_space<vmem>>, vector<16x2048xbf16>
    %cst_45 = arith.constant dense<0.000000e+00> : vector<16x2048xf32>
    %128 = tpu.matmul %126, %127, %cst_45 {dimension_numbers = #tpu.dot_dimension_numbers<[1], [0], [0], [1], [0, 0, 1, 1], [], []>} : vector<16x16xbf16>, vector<16x2048xbf16>, vector<16x2048xf32> -> vector<16x2048xf32>
    %c0_46 = arith.constant 0 : index
    %c0_47 = arith.constant 0 : index
    %129 = vector.load %arg11[%c0_46, %c0_47] : memref<1x2048xf32, #tpu.memory_space<vmem>>, vector<1x2048xf32>
    %130 = vector.broadcast %129 : vector<1x2048xf32> to vector<16x2048xf32>
    %131 = arith.addf %128, %130 : vector<16x2048xf32>
    %cst_48 = arith.constant 0.000000e+00 : f32
    %132 = vector.broadcast %cst_48 : f32 to vector<16x2048xf32>
    %133 = arith.maximumf %131, %132 : vector<16x2048xf32>
    %134 = arith.truncf %133 : vector<16x2048xf32> to vector<16x2048xbf16>
    %c0_49 = arith.constant 0 : index
    %c0_50 = arith.constant 0 : index
    %135 = vector.load %arg12[%c0_49, %c0_50] : memref<2048x16xbf16, #tpu.memory_space<vmem>>, vector<2048x16xbf16>
    %cst_51 = arith.constant dense<0.000000e+00> : vector<16x16xf32>
    %136 = tpu.matmul %134, %135, %cst_51 {dimension_numbers = #tpu.dot_dimension_numbers<[1], [0], [0], [1], [0, 0, 1, 1], [], []>} : vector<16x2048xbf16>, vector<2048x16xbf16>, vector<16x16xf32> -> vector<16x16xf32>
    %c0_52 = arith.constant 0 : index
    %c0_53 = arith.constant 0 : index
    %137 = vector.load %arg13[%c0_52, %c0_53] : memref<1x16xf32, #tpu.memory_space<vmem>>, vector<1x16xf32>
    %138 = vector.broadcast %137 : vector<1x16xf32> to vector<16x16xf32>
    %139 = arith.addf %136, %138 : vector<16x16xf32>
    %140 = arith.addf %125, %139 : vector<16x16xf32>
    %c0_54 = arith.constant 0 : index
    %c0_55 = arith.constant 0 : index
    %141 = vector.load %arg14[%c0_54, %c0_55] : memref<1x16xf32, #tpu.memory_space<vmem>>, vector<1x16xf32>
    %c0_56 = arith.constant 0 : index
    %c0_57 = arith.constant 0 : index
    %142 = vector.load %arg15[%c0_56, %c0_57] : memref<1x16xf32, #tpu.memory_space<vmem>>, vector<1x16xf32>
    %cst_58 = arith.constant dense<0.000000e+00> : vector<16xf32>
    %143 = vector.multi_reduction <add>, %140, %cst_58 [1] : vector<16x16xf32> to vector<16xf32>
    %144 = vector.shape_cast %143 : vector<16xf32> to vector<16x1xf32>
    %cst_59 = arith.constant 1.600000e+01 : f32
    %145 = vector.broadcast %cst_59 : f32 to vector<16x1xf32>
    %146 = arith.divf %144, %145 : vector<16x1xf32>
    %147 = vector.broadcast %146 : vector<16x1xf32> to vector<16x16xf32>
    %148 = arith.subf %140, %147 : vector<16x16xf32>
    %149 = arith.mulf %148, %148 : vector<16x16xf32>
    %cst_60 = arith.constant dense<0.000000e+00> : vector<16xf32>
    %150 = vector.multi_reduction <add>, %149, %cst_60 [1] : vector<16x16xf32> to vector<16xf32>
    %151 = vector.shape_cast %150 : vector<16xf32> to vector<16x1xf32>
    %cst_61 = arith.constant 1.600000e+01 : f32
    %152 = vector.broadcast %cst_61 : f32 to vector<16x1xf32>
    %153 = arith.divf %151, %152 : vector<16x1xf32>
    %cst_62 = arith.constant 9.99999974E-6 : f32
    %154 = vector.broadcast %cst_62 : f32 to vector<16x1xf32>
    %155 = arith.addf %153, %154 : vector<16x1xf32>
    %156 = math.rsqrt %155 : vector<16x1xf32>
    %157 = vector.broadcast %156 : vector<16x1xf32> to vector<16x16xf32>
    %158 = arith.mulf %148, %157 : vector<16x16xf32>
    %159 = vector.broadcast %141 : vector<1x16xf32> to vector<16x16xf32>
    %160 = arith.mulf %158, %159 : vector<16x16xf32>
    %161 = vector.broadcast %142 : vector<1x16xf32> to vector<16x16xf32>
    %162 = arith.addf %160, %161 : vector<16x16xf32>
    %163 = arith.addf %8, %162 : vector<16x16xf32>
    %c0_63 = arith.constant 0 : index
    %c0_64 = arith.constant 0 : index
    %164 = vector.load %arg16[%c0_63, %c0_64] : memref<16x16xf32, #tpu.memory_space<vmem>>, vector<16x16xf32>
    tpu.vector_store %arg16[%c0_63, %c0_64], %163 {strides = array<i32>} : memref<16x16xf32, #tpu.memory_space<vmem>>, vector<16x16xf32>,
    return
  }
}

</mosaic_0001>

<bundles_post_ra>
// kernel: tpu_custom_call.1
= control target key start
LH: loop header
LB: loop body
LE: loop exit
PB: predicated region body
PF: predicated region fallthrough
CT: control target
= control target key end

     0   :  { %s4223_s0 = inlined_call_operand.vmem [shape: f32[16,16], index: 0, kind: input, shape index: {}]   ;;  %s4224_s1 = inlined_call_operand.vmem [shape: f32[16,16], index: 1, kind: input, shape index: {}]   ;;  %s4225_s2 = inlined_call_operand.vmem [shape: bf16[16,16], index: 2, kind: input, shape index: {}]   ;;  %s4226_s3 = inlined_call_operand.vmem [shape: f32[1,16], index: 3, kind: input, shape index: {}]   ;;  %s4227_s4 = inlined_call_operand.vmem [shape: bf16[16,48], index: 4, kind: input, shape index: {}]   ;;  %s4228_s5 = inlined_call_operand.vmem [shape: f32[1,48], index: 5, kind: input, shape index: {}]   ;;  %s4229_s6 = inlined_call_operand.vmem [shape: bf16[16,16], index: 6, kind: input, shape index: {}]   ;;  %s4230_s7 = inlined_call_operand.vmem [shape: f32[1,16], index: 7, kind: input, shape index: {}]   ;;  %s4231_s8 = inlined_call_operand.vmem [shape: f32[1,16], index: 8, kind: input, shape index: {}]   ;;  %s4232_s9 = inlined_call_operand.vmem [shape: f32[1,16], index: 9, kind: input, shape index: {}]   ;;  %s4233_s10 = inlined_call_operand.vmem [shape: bf16[16,2048], index: 10, kind: input, shape index: {}]   ;;  %s4234_s11 = inlined_call_operand.vmem [shape: f32[1,2048], index: 11, kind: input, shape index: {}]   ;;  %s4235_s12 = inlined_call_operand.vmem [shape: bf16[2048,16], index: 12, kind: input, shape index: {}]   ;;  %s4236_s13 = inlined_call_operand.vmem [shape: f32[1,16], index: 13, kind: input, shape index: {}]   ;;  %s4237_s14 = inlined_call_operand.vmem [shape: f32[1,16], index: 14, kind: input, shape index: {}]   ;;  %s4238_s15 = inlined_call_operand.vmem [shape: f32[1,16], index: 15, kind: input, shape index: {}]   ;;  %s4239_s16 = inlined_call_operand.hbm [shape: f32[16,16], index: 16, kind: output, shape index: {}]  }
   0x1   :  { %4241 = sst [smem:[#allocation5_spill]] %s4223_s0 }
   0x2   :  { %v3143_v0 = vld [vmem:[%s4225_s2] sm:$0xff]  ;;  %s4242_s25 = sld [smem:[#allocation5_spill]]  ;;  %vm70_vm0 = vcmask 130048  }
   0x3   :  { %81 = vmatpush.bf16.msra.mxu0 %v3143_v0 }
   0x8   :  { %v55_v1 = vld [vmem:[%s4242_s25] sm:$0xff]  ;;  %v56_v2 = vld [vmem:[%s4242_s25 + $0x8] sm:$0xff] }
   0x9   :  { %v57_v3 = vpack.c.bf16 %v56_v2, %v55_v1 }
   0xa   :  { %21 = vsyncpa [#allocation3], 0  ;;  %v3144_v4 = vld [vmem:[%s4227_s4] sm:$0xff]  ;;  %v89_v10 = vld [vmem:[%s4224_s1 + $0x8] sm:$0xff]  ;;  %s3418_s20 = smov 108   ;;  %s3419_s21 = smov 112  }
   0xb   :  { %2516 = vmatmul.msk.bf16.vlgmr.msra.gmra.mxu0 %vm70_vm0, %v57_v3  ;;  %115 = vmatpush.bf16.msra.mxu1 %v3144_v4  ;;  %v3342_v6 = vld [vmem:[%s4226_s3] ss:$0 sm:$0xff]  ;;  %s3421_s22 = smov 104   ;;  %s3423_s23 = smov 100   ;;  %vm127_vm1 = vcmask 31744   ;;  %vm181_vm2 = vcmask 64512  }
   0xc   :  { %v88_v8 = vld [vmem:[%s4224_s1] sm:$0xff]  ;;  %s3420_s1 = smov 124   ;;  %s3424_s24 = smov 116   ;;  %vm674_vm3 = vcmask 97280  }
   0xd   :  { %v3343_v15 = vld [vmem:[%s4228_s5] ss:$0 sm:$0xff]  ;;  %s3422_s5 = smov 120   ;;  %s3425_s25 = smov 96  }
   0xe   :  { %s3426_s26 = smov 88   ;;  %s3427_s27 = smov 92  }
   0xf   :  { %s3428_s28 = smov 84   ;;  %s3429_s29 = smov 4  }
  0x10   :  { %s3430_s2 = smov 8   ;;  %s3431_s30 = smov 12  }
  0x88   :  { %v83_v5 = vpop.f32.mrf.mxu0 }
  0x89   :  { %v84_v7 = vadd.f32 %v3342_v6, %v83_v5 }
  0x8b   :  { %v3542_v12 = vadd.f32 %v88_v8, %v84_v7 }
  0x90   :  { %v85_v9 = vpop.f32.mrf.mxu0 }
  0x91   :  { %v86_v11 = vadd.f32 %v3342_v6, %v85_v9 }
  0x93   :  { %v3544_v13 = vadd.f32 %v89_v10, %v86_v11 }
  0x95   :  { %v92_v14 = vpack.c.bf16 %v3544_v13, %v3542_v12 }
  0x97   :  { %2521 = vmatmul.msk.bf16.vlgmr.msra.gmra.mxu1 %vm70_vm0, %v92_v14 }
 0x114   :  { %v117_v16 = vpop.f32.mrf.mxu1 }
 0x115   :  { %v118_v17 = vadd.f32 %v3343_v15, %v117_v16 }
 0x117   :  { %258 = vrot.lane.b32.xlu1 %v118_v17, %s3418_s20  ;;  %125 = vrot.lane.b32.xlu0 %v118_v17, %s3419_s21  ;;  %v122_v20 = vmul.f32 0.5, %v118_v17 }
 0x11c   :  { %v119_v18 = vpop.f32.mrf.mxu1 }
 0x11d   :  { %v120_v19 = vadd.f32 %v3343_v15, %v119_v18 }
 0x11f   :  { %286 = vrot.lane.b32.xlu2 %v120_v19, %s3418_s20  ;;  %154 = vrot.lane.b32.xlu0 %v120_v19, %s3419_s21  ;;  %v3552_v21 = vpack.i.bf16 %v120_v19, %v118_v17  ;;  %v123_v22 = vmul.f32 0.5, %v120_v19 }
 0x120   :  { %256 = vrot.lane.b32.xlu1 %v122_v20, %s3420_s1 }
 0x127   :  { %284 = vrot.lane.b32.xlu2 %v123_v22, %s3420_s1  ;;  %388 = vrot.lane.b32.xlu0 %v118_v17, %s3421_s22 }
 0x128   :  { %416 = vrot.lane.b32.xlu1 %v120_v19, %s3421_s22 }
 0x12f   :  { %414 = vrot.lane.b32.xlu0 %v123_v22, %s3422_s5  ;;  %386 = vrot.lane.b32.xlu2 %v122_v20, %s3422_s5 }
 0x130   :  { %518 = vrot.lane.b32.xlu1 %v118_v17, %s3423_s23 }
 0x137   :  { %516 = vrot.lane.b32.xlu0 %v122_v20, %s3424_s24  ;;  %546 = vrot.lane.b32.xlu2 %v120_v19, %s3423_s23 }
 0x138   :  { %544 = vrot.lane.b32.xlu1 %v123_v22, %s3424_s24 }
 0x179   :  { %v287_v23 = vpop.permute.xlu2 %286 }
 0x181   :  { %v285_v24 = vpop.permute.xlu2 %284 }
 0x189   :  { %v259_v25 = vpop.permute.xlu1 %258  ;;  %v126_v26 = vpop.permute.xlu0 %125 }
 0x18a   :  { %2522 = vmatpush.xpose.msk.msra.mxu2 %vm127_vm1, %v126_v26  ;;  %2528 = vmatpush.xpose.msk.msrb.mxu1 %vm127_vm1, %v259_v25  ;;  %v387_v28 = vpop.permute.xlu2 %386 }
 0x18d   :  { %2523 = vmatmul.msk.f32.vlgmr.msra.gmra.mxu2 %vm127_vm1, %v122_v20 }
 0x18e   :  { %2530 = vmatpush.xpose.msk.msra.mxu1 %vm127_vm1, %v287_v23 }
 0x191   :  { %v155_v27 = vpop.permute.xlu0 %154 }
 0x192   :  { %v257_v29 = vpop.permute.xlu1 %256  ;;  %2524 = vmatpush.xpose.msk.msra.mxu3 %vm127_vm1, %v155_v27  ;;  %v547_v32 = vpop.permute.xlu2 %546 }
 0x193   :  { %2529 = vmatmul.msk.f32.vlgmr.msrb.gmra.mxu1 %vm127_vm1, %v257_v29 }
 0x195   :  { %2525 = vmatmul.msk.f32.vlgmr.msra.gmra.mxu3 %vm127_vm1, %v123_v22 }
 0x199   :  { %v389_v30 = vpop.permute.xlu0 %388 }
 0x19a   :  { %v417_v31 = vpop.permute.xlu1 %416  ;;  %2534 = vmatpush.xpose.msk.msrb.mxu0 %vm127_vm1, %v389_v30 }
 0x19b   :  { %2531 = vmatmul.msk.f32.vlgmr.msra.gmra.mxu1 %vm127_vm1, %v285_v24 }
 0x19c   :  { %2536 = vmatpush.xpose.msk.msrb.mxu1 %vm127_vm1, %v417_v31 }
 0x19d   :  { %2535 = vmatmul.msk.f32.vlgmr.msrb.gmra.mxu0 %vm127_vm1, %v387_v28 }
 0x1a0   :  { %2542 = vmatpush.xpose.msk.msra.mxu1 %vm127_vm1, %v547_v32 }
 0x1a1   :  { %v415_v33 = vpop.permute.xlu0 %414 }
 0x1a2   :  { %v519_v34 = vpop.permute.xlu1 %518 }
 0x1a3   :  { %2537 = vmatmul.msk.f32.vlgmr.msrb.gmra.mxu1 %vm127_vm1, %v415_v33  ;;  %2540 = vmatpush.xpose.msk.msra.mxu0 %vm127_vm1, %v519_v34 }
 0x1a9   :  { %v517_v35 = vpop.permute.xlu0 %516 }
 0x1aa   :  { %v545_v36 = vpop.permute.xlu1 %544  ;;  %2541 = vmatmul.msk.f32.vlgmr.msra.gmra.mxu0 %vm127_vm1, %v517_v35 }
 0x1ab   :  { %2543 = vmatmul.msk.f32.vlgmr.msra.gmra.mxu1 %vm127_vm1, %v545_v36 }
 0x210   :  { %v281_v37 = vpop.f32.mrf.mxu1  ;;  %v150_v44 = vpop.f32.mrf.mxu2 }
 0x211   :  { %v312_v38 = vsel %vm181_vm2, %v281_v37, -inf  ;;  %v182_v47 = vsel %vm181_vm2, %v150_v44, -inf }
 0x212   :  { %313 = vmax.xlane.f32.xlu1 %v312_v38 }
 0x218   :  { %v309_v39 = vpop.f32.mrf.mxu1  ;;  %v178_v40 = vpop.f32.mrf.mxu3 }
 0x219   :  { %v185_v41 = vsel %vm181_vm2, %v178_v40, -inf  ;;  %v315_v50 = vsel %vm181_vm2, %v309_v39, -inf }
 0x21a   :  { %186 = vmax.xlane.f32.xlu0 %v185_v41  ;;  %v411_v42 = vpop.f32.mrf.mxu0 }
 0x21b   :  { %v442_v43 = vsel %vm181_vm2, %v411_v42, -inf }
 0x21c   :  { %443 = vmax.xlane.f32.xlu2 %v442_v43 }
 0x220   :  { %v439_v45 = vpop.f32.mrf.mxu1 }
 0x221   :  { %v445_v46 = vsel %vm181_vm2, %v439_v45, -inf }
 0x222   :  { %446 = vmax.xlane.f32.xlu0 %v445_v46 }
 0x224   :  { %183 = vmax.xlane.f32.xlu2 %v182_v47 }
 0x227   :  { %v541_v48 = vpop.f32.mrf.mxu0 }
 0x228   :  { %v572_v49 = vsel %vm181_vm2, %v541_v48, -inf  ;;  %v569_v51 = vpop.f32.mrf.mxu1 }
 0x229   :  { %573 = vmax.xlane.f32.xlu1 %v572_v49  ;;  %v575_v52 = vsel %vm181_vm2, %v569_v51, -inf }
 0x22c   :  { %316 = vmax.xlane.f32.xlu2 %v315_v50 }
 0x234   :  { %576 = vmax.xlane.f32.xlu2 %v575_v52 }
 0x242   :  { %3308 = vrot.lane.b32.xlu1 %v3552_v21, %s3425_s25 }
 0x285   :  { %v314_v53 = vpop.xlane.xlu1 %313 }
 0x286   :  { %v318_v54 = vsub.f32 %v281_v37, %v314_v53 }
 0x288   :  { %v320_v55 = vmul.f32 1.442695, %v318_v54 }
 0x28a   :  { %3350 = vpow2.f32 %v320_v55 }
 0x28d   :  { %v187_v56 = vpop.xlane.xlu0 %186 }
 0x28e   :  { %v189_v57 = vsub.f32 %v178_v40, %v187_v56 }
 0x28f   :  { %v444_v58 = vpop.xlane.xlu2 %443 }
 0x290   :  { %v3579_v59 = vpop.eup %3350  ;;  %v192_v60 = vmul.f32 1.442695, %v189_v57  ;;  %v448_v61 = vsub.f32 %v411_v42, %v444_v58 }
 0x291   :  { %v324_v62 = vsel %vm181_vm2, %v3579_v59, 0.0 }
 0x292   :  { %3352 = vpow2.f32 %v192_v60  ;;  %v450_v63 = vmul.f32 1.442695, %v448_v61  ;;  %325 = vadd.xlane.f32.xlu2 %v324_v62 }
 0x294   :  { %3354 = vpow2.f32 %v450_v63 }
 0x295   :  { %v447_v17 = vpop.xlane.xlu0 %446 }
 0x296   :  { %v449_v19 = vsub.f32 %v439_v45, %v447_v17 }
 0x297   :  { %v184_v0 = vpop.xlane.xlu2 %183 }
 0x298   :  { %v3353_v1 = vpop.eup %3352  ;;  %v188_v2 = vsub.f32 %v150_v44, %v184_v0  ;;  %v452_v22 = vmul.f32 1.442695, %v449_v19 }
 0x299   :  { %v197_v3 = vsel %vm181_vm2, %v3353_v1, 0.0 }
 0x29a   :  { %v3584_v4 = vpop.eup %3354  ;;  %v190_v5 = vmul.f32 1.442695, %v188_v2  ;;  %198 = vadd.xlane.f32.xlu1 %v197_v3 }
 0x29b   :  { %v454_v6 = vsel %vm181_vm2, %v3584_v4, 0.0 }
 0x29c   :  { %3356 = vpow2.f32 %v190_v5  ;;  %455 = vadd.xlane.f32.xlu2 %v454_v6  ;;  %v574_v7 = vpop.xlane.xlu1 %573 }
 0x29d   :  { %v578_v11 = vsub.f32 %v541_v48, %v574_v7 }
 0x29f   :  { %v317_v8 = vpop.xlane.xlu2 %316  ;;  %v580_v16 = vmul.f32 1.442695, %v578_v11 }
 0x2a0   :  { %v319_v9 = vsub.f32 %v309_v39, %v317_v8 }
 0x2a2   :  { %v3357_v10 = vpop.eup %3356  ;;  %v322_v14 = vmul.f32 1.442695, %v319_v9 }
 0x2a3   :  { %v194_v15 = vsel %vm181_vm2, %v3357_v10, 0.0 }
 0x2a4   :  { %3358 = vpow2.f32 %v322_v14  ;;  %195 = vadd.xlane.f32.xlu0 %v194_v15 }
 0x2a5   :  { %3360 = vpow2.f32 %v580_v16  ;;  %v3145_v16 = vld [vmem:[%s4229_s6] sm:$0xff] }
 0x2a6   :  { %3362 = vpow2.f32 %v452_v22  ;;  %700 = vmatpush.bf16.msrb.mxu0 %v3145_v16 }
 0x2a7   :  { %v577_v23 = vpop.xlane.xlu2 %576 }
 0x2a8   :  { %v579_v25 = vsub.f32 %v569_v51, %v577_v23 }
 0x2aa   :  { %v3359_v18 = vpop.eup %3358  ;;  %v582_v30 = vmul.f32 1.442695, %v579_v25 }
 0x2ab   :  { %v327_v20 = vsel %vm181_vm2, %v3359_v18, 0.0  ;;  %v3590_v24 = vpop.eup %3360 }
 0x2ac   :  { %328 = vadd.xlane.f32.xlu0 %v327_v20  ;;  %v584_v26 = vsel %vm181_vm2, %v3590_v24, 0.0  ;;  %v3363_v31 = vpop.eup %3362  ;;  %3364 = vpow2.f32 %v582_v30 }
 0x2ad   :  { %v457_v32 = vsel %vm181_vm2, %v3363_v31, 0.0 }
 0x2b2   :  { %v3365_v33 = vpop.eup %3364 }
 0x2b3   :  { %3318 = vrot.lane.b32.xlu1 %v3552_v21, %s3426_s26  ;;  %v587_v34 = vsel %vm181_vm2, %v3365_v33, 0.0 }
 0x2b4   :  { %v3309_v27 = vpop.permute.xlu1 %3308  ;;  %3313 = vrot.lane.b32.xlu2 %v3552_v21, %s3427_s27  ;;  %585 = vadd.xlane.f32.xlu0 %v584_v26 }
 0x2b5   :  { %v3310_v28 = vunpack.i.l.bf16 %v3309_v27  ;;  %v3311_v29 = vunpack.i.h.bf16 %v3309_v27 }
 0x2b7   :  { %225 = vmatpush.msrb.mxu2 %v3310_v28  ;;  %251 = vmatpush.msrb.mxu3 %v3311_v29 }
 0x2bc   :  { %458 = vadd.xlane.f32.xlu0 %v457_v32 }
 0x2c4   :  { %588 = vadd.xlane.f32.xlu0 %v587_v34  ;;  %v3344_v34 = vld [vmem:[%s4230_s7] ss:$0 sm:$0xff]  ;;  %s2500_s7 = sshll.u32 %s4239_s16, 4  ;;  %s2501_s7 = int_to_ptr.hbm [resolvable:$true] %s2500_s7 }
 0x2d8   :  { %3323 = vrot.lane.b32.xlu0 %v3552_v21, %s3428_s28 }
 0x305   :  { %v326_v35 = vpop.xlane.xlu2 %325 }
 0x30d   :  { %v199_v36 = vpop.xlane.xlu1 %198 }
 0x30e   :  { %3366 = vrcp.f32 %v199_v36 }
 0x30f   :  { %v456_v37 = vpop.xlane.xlu2 %455 }
 0x314   :  { %v3367_v38 = vpop.eup %3366 }
 0x315   :  { %v203_v39 = vmul.f32 %v3367_v38, %v3353_v1 }
 0x317   :  { %2527 = vmatmul.msk.f32.vlgmr.msrb.gmra.mxu3 %vm181_vm2, %v203_v39  ;;  %v196_v40 = vpop.xlane.xlu0 %195  ;;  %v3314_v41 = vpop.permute.xlu2 %3313 }
 0x318   :  { %3368 = vrcp.f32 %v196_v40  ;;  %v3316_v42 = vunpack.i.h.bf16 %v3314_v41  ;;  %v3315_v43 = vunpack.i.l.bf16 %v3314_v41 }
 0x319   :  { %3370 = vrcp.f32 %v326_v35 }
 0x31a   :  { %355 = vmatpush.msra.mxu2 %v3315_v43  ;;  %381 = vmatpush.msra.mxu3 %v3316_v42  ;;  %v3432_v43 = vmov 16.0  }
 0x31e   :  { %v3369_v44 = vpop.eup %3368 }
 0x31f   :  { %v329_v45 = vpop.xlane.xlu0 %328  ;;  %v202_v46 = vmul.f32 %v3369_v44, %v3357_v10  ;;  %v3371_v21 = vpop.eup %3370 }
 0x320   :  { %3372 = vrcp.f32 %v329_v45  ;;  %v332_v51 = vmul.f32 %v3371_v21, %v3579_v59 }
 0x321   :  { %2526 = vmatmul.msk.f32.vlgmr.msrb.gmra.mxu2 %vm181_vm2, %v202_v46  ;;  %3374 = vrcp.f32 %v456_v37 }
 0x325   :  { %v3319_v47 = vpop.permute.xlu1 %3318 }
 0x326   :  { %v3373_v48 = vpop.eup %3372  ;;  %v3321_v49 = vunpack.i.h.bf16 %v3319_v47  ;;  %v3320_v50 = vunpack.i.l.bf16 %v3319_v47 }
 0x327   :  { %v333_v52 = vmul.f32 %v3373_v48, %v3359_v18  ;;  %v586_v53 = vpop.xlane.xlu0 %585  ;;  %v3375_v54 = vpop.eup %3374 }
 0x328   :  { %485 = vmatpush.msrb.mxu2 %v3320_v50  ;;  %511 = vmatpush.msrb.mxu3 %v3321_v49  ;;  %v462_v55 = vmul.f32 %v3375_v54, %v3584_v4 }
 0x329   :  { %2532 = vmatmul.msk.f32.vlgmr.msra.gmra.mxu2 %vm181_vm2, %v332_v51  ;;  %2533 = vmatmul.msk.f32.vlgmr.msra.gmra.mxu3 %vm181_vm2, %v333_v52 }
 0x32f   :  { %v459_v56 = vpop.xlane.xlu0 %458 }
 0x330   :  { %3376 = vrcp.f32 %v459_v56 }
 0x331   :  { %2538 = vmatmul.msk.f32.vlgmr.msrb.gmra.mxu2 %vm181_vm2, %v462_v55  ;;  %3378 = vrcp.f32 %v586_v53 }
 0x336   :  { %v3377_v57 = vpop.eup %3376 }
 0x337   :  { %v463_v58 = vmul.f32 %v3377_v57, %v3363_v31  ;;  %v589_v59 = vpop.xlane.xlu0 %588  ;;  %v3379_v60 = vpop.eup %3378 }
 0x338   :  { %3380 = vrcp.f32 %v589_v59  ;;  %v592_v1 = vmul.f32 %v3379_v60, %v3590_v24 }
 0x339   :  { %2539 = vmatmul.msk.f32.vlgmr.msrb.gmra.mxu3 %vm181_vm2, %v463_v58  ;;  %3382 = vrcp.f32 %v3432_v43 }
 0x33e   :  { %v3381_v61 = vpop.eup %3380 }
 0x33f   :  { %v593_v2 = vmul.f32 %v3381_v61, %v3365_v33  ;;  %v3383_v44 = vpop.eup %3382 }
 0x340   :  { %v718_v45 = vmul.f32 16.0, %v3383_v44  ;;  %vm722_vm4 = vweird.f32 %v3383_v44 }
 0x342   :  { %v719_v46 = vsub.f32 1.0, %v718_v45 }
 0x344   :  { %v720_v21 = vmul.f32 %v3383_v44, %v719_v46 }
 0x346   :  { %v721_v47 = vadd.f32 %v3383_v44, %v720_v21 }
 0x348   :  { %v3626_v48 = vsel %vm722_vm4, %v3383_v44, %v721_v47  ;;  %v3346_v44 = vld [vmem:[%s4232_s9] ss:$0 sm:$0xff]  ;;  %s3434_s9 = smov 128  }
 0x349   :  { %v2585_v47 = vld [vmem:[%s4233_s10 + $0x20] sm:$0xf] }
 0x34a   :  { %v3324_v62 = vpop.permute.xlu0 %3323 }
 0x34b   :  { %v3326_v63 = vunpack.i.h.bf16 %v3324_v62  ;;  %v3325_v0 = vunpack.i.l.bf16 %v3324_v62  ;;  %v2553_v62 = vld [vmem:[%s4233_s10] sm:$0xf] }
 0x34d   :  { %615 = vmatpush.msra.mxu2 %v3325_v0  ;;  %641 = vmatpush.msra.mxu3 %v3326_v63  ;;  %v3154_v63 = vld [vmem:[%s4233_s10 + $0x3c] sm:$0xf0] }
 0x34e   :  { %2544 = vmatmul.msk.f32.vlgmr.msra.gmra.mxu2 %vm181_vm2, %v592_v1  ;;  %2545 = vmatmul.msk.f32.vlgmr.msra.gmra.mxu3 %vm181_vm2, %v593_v2  ;;  %v2554_v0 = vor.u32 %v3154_v63, %v2553_v62  ;;  %v3146_v1 = vld [vmem:[%s4233_s10 + $0x4] sm:$0xf]  ;;  %v2601_v63 = vld [vmem:[%s4233_s10 + $0x30] sm:$0xf] }
 0x34f   :  { %v2555_v2 = vld [vmem:[%s4233_s10 + $0x40] sm:$0xf0] }
 0x350   :  { %915 = vmatpush.bf16.msrb.mxu1 %v2554_v0  ;;  %v3160_v0 = vld [vmem:[%s4233_s10 + $0x6c] sm:$0xf0] }
 0x39a   :  { %v253_v3 = vpop.f32.mrf.mxu3 }
 0x3a4   :  { %v227_v4 = vpop.f32.mrf.mxu2 }
 0x3ac   :  { %v357_v5 = vpop.f32.mrf.mxu2  ;;  %v383_v6 = vpop.f32.mrf.mxu3 }
 0x3ad   :  { %v3327_v7 = vpack.i.bf16 %v383_v6, %v357_v5  ;;  %v3155_v5 = vld [vmem:[%s4233_s10 + $0x44] sm:$0xf0]  ;;  %v3147_v6 = vld [vmem:[%s4233_s10 + $0xc] sm:$0xf] }
 0x3af   :  { %3328 = vrot.lane.b32.xlu1 %v3327_v7, %s3429_s29  ;;  %v2563_v7 = vld [vmem:[%s4233_s10 + $0x48] sm:$0xf0] }
 0x3b4   :  { %v487_v8 = vpop.f32.mrf.mxu2 }
 0x3bc   :  { %v513_v9 = vpop.f32.mrf.mxu3 }
 0x3bd   :  { %v3332_v10 = vpack.i.bf16 %v513_v9, %v487_v8  ;;  %v2566_v9 = vor.u32 %v3147_v6, %v2563_v7  ;;  %v2611_v6 = vld [vmem:[%s4233_s10 + $0x78] sm:$0xf0]  ;;  %v2602_v7 = vor.u32 %v3160_v0, %v2601_v63  ;;  %v3206_v0 = vld [vmem:[%s4235_s12 + $0x160] sm:$0xff] }
 0x3be   :  { %v3221_v63 = vld [vmem:[%s4235_s12 + $0x1d8] sm:$0xff] }
 0x3bf   :  { %3333 = vrot.lane.b32.xlu2 %v3332_v10, %s3430_s2  ;;  %957 = vmatpush.bf16.msra.mxu0 %v2566_v9 }
 0x3d1   :  { %v617_v11 = vpop.f32.mrf.mxu2  ;;  %v643_v14 = vpop.f32.mrf.mxu3 }
 0x3d2   :  { %v3337_v15 = vpack.i.bf16 %v643_v14, %v617_v11  ;;  %v2569_v11 = vld [vmem:[%s4233_s10 + $0x10] sm:$0xf] }
 0x3d3   :  { %v3156_v14 = vld [vmem:[%s4233_s10 + $0x4c] sm:$0xf0] }
 0x3d4   :  { %3338 = vrot.lane.b32.xlu1 %v3337_v15, %s3431_s30  ;;  %v3148_v15 = vld [vmem:[%s4233_s10 + $0x14] sm:$0xf] }
 0x419   :  { %v3334_v20 = vpop.permute.xlu2 %3333 }
 0x41a   :  { %v3336_v24 = vunpack.i.h.bf16 %v3334_v20  ;;  %v3335_v25 = vunpack.i.l.bf16 %v3334_v20  ;;  %v3157_v20 = vld [vmem:[%s4233_s10 + $0x54] sm:$0xf0] }
 0x421   :  { %v3329_v17 = vpop.permute.xlu1 %3328 }
 0x422   :  { %v3331_v18 = vunpack.i.h.bf16 %v3329_v17  ;;  %v3330_v19 = vunpack.i.l.bf16 %v3329_v17  ;;  %v2570_v17 = vor.u32 %v3156_v14, %v2569_v11  ;;  %v3169_v11 = vld [vmem:[%s4235_s12 + $0x38] sm:$0xff] }
 0x423   :  { %v3193_v14 = vld [vmem:[%s4235_s12 + $0xf8] sm:$0xff] }
 0x424   :  { %v671_v22 = vsel %vm127_vm1, %v253_v3, %v3331_v18  ;;  %v670_v23 = vsel %vm127_vm1, %v227_v4, %v3330_v19  ;;  %v2561_v3 = vld [vmem:[%s4233_s10 + $0x8] sm:$0xf]  ;;  %v2558_v4 = vor.u32 %v3146_v1, %v2555_v2  ;;  %v2571_v18 = vld [vmem:[%s4233_s10 + $0x50] sm:$0xf0]  ;;  %v2577_v19 = vld [vmem:[%s4233_s10 + $0x18] sm:$0xf]  ;;  %971 = vmatpush.bf16.msra.mxu1 %v2570_v17 }
 0x425   :  { %v672_v29 = vsel %vm181_vm2, %v670_v23, %v3335_v25  ;;  %v673_v30 = vsel %vm181_vm2, %v671_v22, %v3336_v24  ;;  %v2562_v8 = vor.u32 %v3155_v5, %v2561_v3  ;;  %v2574_v22 = vor.u32 %v3148_v15, %v2571_v18  ;;  %v3149_v24 = vld [vmem:[%s4233_s10 + $0x1c] sm:$0xf]  ;;  %v3152_v1 = vld [vmem:[%s4233_s10 + $0x34] sm:$0xf]  ;;  %v2609_v3 = vld [vmem:[%s4233_s10 + $0x38] sm:$0xf] }
 0x426   :  { %929 = vmatpush.bf16.msrb.mxu2 %v2558_v4  ;;  %v2578_v23 = vor.u32 %v3157_v20, %v2577_v19  ;;  %v2579_v25 = vld [vmem:[%s4233_s10 + $0x58] sm:$0xf0]  ;;  %v2603_v2 = vld [vmem:[%s4233_s10 + $0x70] sm:$0xf0]  ;;  %v3161_v4 = vld [vmem:[%s4233_s10 + $0x74] sm:$0xf0] }
 0x427   :  { %943 = vmatpush.bf16.msrb.mxu3 %v2562_v8  ;;  %v3153_v5 = vld [vmem:[%s4233_s10 + $0x3c] sm:$0xf]  ;;  %v2606_v8 = vor.u32 %v3152_v1, %v2603_v2  ;;  %v2610_v9 = vor.u32 %v3161_v4, %v2609_v3  ;;  %v3168_v17 = vld [vmem:[%s4235_s12 + $0x30] sm:$0xff]  ;;  %v3214_v1 = vld [vmem:[%s4235_s12 + $0x1a0] sm:$0xff] }
 0x428   :  { %v3177_v15 = vld [vmem:[%s4235_s12 + $0x78] sm:$0xff]  ;;  %v3192_v18 = vld [vmem:[%s4235_s12 + $0xf0] sm:$0xff] }
 0x429   :  { %v3176_v19 = vld [vmem:[%s4235_s12 + $0x70] sm:$0xff]  ;;  %v3205_v4 = vld [vmem:[%s4235_s12 + $0x158] sm:$0xff] }
 0x42a   :  { %985 = vmatpush.bf16.msra.mxu2 %v2574_v22  ;;  %v3184_v20 = vld [vmem:[%s4235_s12 + $0xb0] sm:$0xff]  ;;  %v3167_v22 = vld [vmem:[%s4235_s12 + $0x28] sm:$0xff] }
 0x42b   :  { %999 = vmatpush.bf16.msra.mxu3 %v2578_v23  ;;  %v3191_v23 = vld [vmem:[%s4235_s12 + $0xe8] sm:$0xff]  ;;  %v3196_v2 = vld [vmem:[%s4235_s12 + $0x110] sm:$0xff] }
 0x42c   :  { %v3220_v3 = vld [vmem:[%s4235_s12 + $0x1d0] sm:$0xff] }
 0x446   :  { %v3339_v26 = vpop.permute.xlu1 %3338 }
 0x447   :  { %v3341_v27 = vunpack.i.h.bf16 %v3339_v26  ;;  %v3340_v28 = vunpack.i.l.bf16 %v3339_v26 }
 0x449   :  { %v676_v31 = vsel %vm674_vm3, %v673_v30, %v3341_v27  ;;  %v675_v32 = vsel %vm674_vm3, %v672_v29, %v3340_v28  ;;  %v2582_v28 = vor.u32 %v3149_v24, %v2579_v25  ;;  %v3175_v24 = vld [vmem:[%s4235_s12 + $0x68] sm:$0xff] }
 0x44a   :  { %v677_v33 = vpack.c.bf16 %v676_v31, %v675_v32  ;;  %v3183_v25 = vld [vmem:[%s4235_s12 + $0xa8] sm:$0xff] }
 0x44c   :  { %2550 = vmatmul.msk.bf16.vlgmr.msrb.gmra.mxu0 %vm70_vm0, %v677_v33 }
 0x44d   :  { %1013 = vmatpush.bf16.msrb.mxu0 %v2582_v28  ;;  %v3174_v28 = vld [vmem:[%s4235_s12 + $0x60] sm:$0xff] }
 0x4c9   :  { %v702_v35 = vpop.f32.mrf.mxu0 }
 0x4ca   :  { %v703_v36 = vadd.f32 %v3344_v34, %v702_v35 }
 0x4cc   :  { %v707_v37 = vadd.f32 %v703_v36, %v3542_v12 }
 0x4ce   :  { %v711_v38 = vsel %vm70_vm0, %v707_v37, 0.0 }
 0x4cf   :  { %712 = vadd.xlane.f32.xlu2 %v711_v38 }
 0x4d1   :  { %v704_v39 = vpop.f32.mrf.mxu0 }
 0x4d2   :  { %v705_v40 = vadd.f32 %v3344_v34, %v704_v39 }
 0x4d4   :  { %v708_v41 = vadd.f32 %v705_v40, %v3544_v13  ;;  %v3345_v40 = vld [vmem:[%s4231_s8] ss:$0 sm:$0xff] }
 0x4d6   :  { %v714_v42 = vsel %vm70_vm0, %v708_v41, 0.0 }
 0x4d7   :  { %715 = vadd.xlane.f32.xlu1 %v714_v42 }
 0x542   :  { %v713_v49 = vpop.xlane.xlu2 %712 }
 0x543   :  { %v724_v50 = vmul.f32 %v3626_v48, %v713_v49  ;;  %v3158_v49 = vld [vmem:[%s4233_s10 + $0x5c] sm:$0xf0] }
 0x545   :  { %v3629_v51 = vsub.f32 %v707_v37, %v724_v50  ;;  %v3150_v50 = vld [vmem:[%s4233_s10 + $0x24] sm:$0xf] }
 0x547   :  { %v728_v52 = vmul.f32 %v3629_v51, %v3629_v51 }
 0x549   :  { %v730_v53 = vsel %vm70_vm0, %v728_v52, 0.0  ;;  %v2593_v52 = vld [vmem:[%s4233_s10 + $0x28] sm:$0xf] }
 0x54a   :  { %v716_v54 = vpop.xlane.xlu1 %715  ;;  %731 = vadd.xlane.f32.xlu0 %v730_v53 }
 0x54b   :  { %v725_v55 = vmul.f32 %v3626_v48, %v716_v54 }
 0x54d   :  { %v3635_v56 = vsub.f32 %v708_v41, %v725_v55  ;;  %v3159_v55 = vld [vmem:[%s4233_s10 + $0x64] sm:$0xf0] }
 0x54f   :  { %v729_v57 = vmul.f32 %v3635_v56, %v3635_v56 }
 0x551   :  { %v733_v58 = vsel %vm70_vm0, %v729_v57, 0.0  ;;  %v2595_v57 = vld [vmem:[%s4233_s10 + $0x68] sm:$0xf0] }
 0x552   :  { %734 = vadd.xlane.f32.xlu2 %v733_v58 }
 0x5bd   :  { %v732_v59 = vpop.xlane.xlu0 %731 }
 0x5be   :  { %v736_v60 = vmul.f32 %v732_v59, %v3626_v48  ;;  %v2586_v59 = vor.u32 %v3158_v49, %v2585_v47  ;;  %v3209_v47 = vld [vmem:[%s4235_s12 + $0x178] sm:$0xff] }
 0x5bf   :  { %v3217_v49 = vld [vmem:[%s4235_s12 + $0x1b8] sm:$0xff] }
 0x5c0   :  { %v738_v61 = vadd.f32 1e-05, %v736_v60 }
 0x5c2   :  { %3384 = vrsqrt.f32 %v738_v61  ;;  %vm746_vm6 = vweird.f32 %v738_v61 }
 0x5c5   :  { %v735_v10 = vpop.xlane.xlu2 %734 }
 0x5c6   :  { %v737_v16 = vmul.f32 %v735_v10, %v3626_v48  ;;  %v2614_v10 = vor.u32 %v3153_v5, %v2611_v6  ;;  %v3213_v5 = vld [vmem:[%s4235_s12 + $0x198] sm:$0xff]  ;;  %v3195_v6 = vld [vmem:[%s4235_s12 + $0x108] sm:$0xff] }
 0x5c8   :  { %v3385_v26 = vpop.eup %3384  ;;  %v739_v27 = vadd.f32 1e-05, %v737_v16  ;;  %v3185_v16 = vld [vmem:[%s4235_s12 + $0xb8] sm:$0xff] }
 0x5c9   :  { %v741_v29 = vmul.f32 %v3385_v26, %v738_v61  ;;  %vm747_vm5 = vweird.f32 %v3385_v26  ;;  %v2594_v61 = vor.u32 %v3159_v55, %v2593_v52  ;;  %v3208_v52 = vld [vmem:[%s4235_s12 + $0x170] sm:$0xff] }
 0x5ca   :  { %3386 = vrsqrt.f32 %v739_v27  ;;  %vm748_vm7 = vmor %vm746_vm6, %vm747_vm5  ;;  %vm756_vm9 = vweird.f32 %v739_v27  ;;  %v3216_v55 = vld [vmem:[%s4235_s12 + $0x1b0] sm:$0xff] }
 0x5cb   :  { %v742_v30 = vmul.f32 %v3385_v26, %v741_v29  ;;  %v3182_v29 = vld [vmem:[%s4235_s12 + $0xa0] sm:$0xff] }
 0x5cd   :  { %v743_v31 = vmul.f32 0.5, %v742_v30  ;;  %v3165_v30 = vld [vmem:[%s4235_s12 + $0x18] sm:$0xff] }
 0x5cf   :  { %v744_v32 = vsub.f32 1.5, %v743_v31  ;;  %v3189_v31 = vld [vmem:[%s4235_s12 + $0xd8] sm:$0xff] }
 0x5d0   :  { %v3387_v33 = vpop.eup %3386 }
 0x5d1   :  { %v745_v34 = vmul.f32 %v3385_v26, %v744_v32  ;;  %v751_v35 = vmul.f32 %v3387_v33, %v739_v27  ;;  %vm757_vm8 = vweird.f32 %v3387_v33  ;;  %v3190_v27 = vld [vmem:[%s4235_s12 + $0xe0] sm:$0xff]  ;;  %v3173_v32 = vld [vmem:[%s4235_s12 + $0x58] sm:$0xff] }
 0x5d2   :  { %vm758_vm10 = vmor %vm756_vm9, %vm757_vm8 }
 0x5d3   :  { %v752_v36 = vmul.f32 %v3387_v33, %v751_v35  ;;  %v749_v37 = vsel %vm748_vm7, %v3385_v26, %v745_v34  ;;  %v3166_v26 = vld [vmem:[%s4235_s12 + $0x20] sm:$0xff]  ;;  %v3164_v34 = vld [vmem:[%s4235_s12 + $0x10] sm:$0xff] }
 0x5d4   :  { %v760_v41 = vmul.f32 %v749_v37, %v3629_v51  ;;  %v2587_v51 = vld [vmem:[%s4233_s10 + $0x60] sm:$0xf0]  ;;  %v3188_v35 = vld [vmem:[%s4235_s12 + $0xd0] sm:$0xff] }
 0x5d5   :  { %v753_v38 = vmul.f32 0.5, %v752_v36  ;;  %v2590_v60 = vor.u32 %v3150_v50, %v2587_v51  ;;  %v3172_v36 = vld [vmem:[%s4235_s12 + $0x50] sm:$0xff] }
 0x5d6   :  { %v765_v45 = vmul.f32 %v3345_v40, %v760_v41  ;;  %v3180_v37 = vld [vmem:[%s4235_s12 + $0x90] sm:$0xff]  ;;  %v3179_v41 = vld [vmem:[%s4235_s12 + $0x88] sm:$0xff] }
 0x5d7   :  { %v754_v39 = vsub.f32 1.5, %v753_v38  ;;  %v3163_v38 = vld [vmem:[%s4235_s12 + $0x8] sm:$0xff]  ;;  %v3200_v50 = vld [vmem:[%s4235_s12 + $0x130] sm:$0xff] }
 0x5d8   :  { %v3713_v53 = vadd.f32 %v3346_v44, %v765_v45  ;;  %v3225_v45 = vld [vmem:[%s4235_s12 + $0x1f8] sm:$0xff]  ;;  %v3224_v51 = vld [vmem:[%s4235_s12 + $0x1f0] sm:$0xff] }
 0x5d9   :  { %v755_v42 = vmul.f32 %v3387_v33, %v754_v39  ;;  %v3187_v39 = vld [vmem:[%s4235_s12 + $0xc8] sm:$0xff] }
 0x5db   :  { %v759_v43 = vsel %vm758_vm10, %v3387_v33, %v755_v42  ;;  %v3181_v33 = vld [vmem:[%s4235_s12 + $0x98] sm:$0xff]  ;;  %v3162_v42 = vld [vmem:[%s4235_s12] sm:$0xff] }
 0x5dc   :  { %v761_v46 = vmul.f32 %v759_v43, %v3635_v56  ;;  %v3151_v56 = vld [vmem:[%s4233_s10 + $0x2c] sm:$0xf]  ;;  %v3186_v43 = vld [vmem:[%s4235_s12 + $0xc0] sm:$0xff] }
 0x5dd   :  { %v2598_v62 = vor.u32 %v3151_v56, %v2595_v57  ;;  %v3199_v56 = vld [vmem:[%s4235_s12 + $0x128] sm:$0xff] }
 0x5de   :  { %v766_v21 = vmul.f32 %v3345_v40, %v761_v46  ;;  %v3171_v40 = vld [vmem:[%s4235_s12 + $0x48] sm:$0xff]  ;;  %v3170_v46 = vld [vmem:[%s4235_s12 + $0x40] sm:$0xff] }
 0x5df   :  { %v3223_v57 = vld [vmem:[%s4235_s12 + $0x1e8] sm:$0xff] }
 0x5e0   :  { %v3715_v54 = vadd.f32 %v3346_v44, %v766_v21  ;;  %v3201_v44 = vld [vmem:[%s4235_s12 + $0x138] sm:$0xff]  ;;  %v3178_v21 = vld [vmem:[%s4235_s12 + $0x80] sm:$0xff] }
 0x5e2   :  { %v3728_v58 = vpack.c.bf16 %v3715_v54, %v3713_v53 }
 0x5e4   :  { %2615 = vmatmul.msk.bf16.vlgmr.msrb.gmra.mxu1 %vm70_vm0, %v3728_v58  ;;  %2616 = vmatmul.msk.bf16.vlgmr.msrb.gmra.mxu2 %vm70_vm0, %v3728_v58 }
 0x5e5   :  { %2617 = vmatmul.msk.bf16.vlgmr.msrb.gmra.mxu3 %vm70_vm0, %v3728_v58  ;;  %2618 = vmatmul.msk.bf16.vlgmr.msra.gmra.mxu0 %vm70_vm0, %v3728_v58 }
 0x5e6   :  { %1027 = vmatpush.bf16.msrb.mxu1 %v2586_v59  ;;  %1041 = vmatpush.bf16.msrb.mxu2 %v2590_v60  ;;  %v3222_v59 = vld [vmem:[%s4235_s12 + $0x1e0] sm:$0xff]  ;;  %v3207_v60 = vld [vmem:[%s4235_s12 + $0x168] sm:$0xff] }
 0x5e7   :  { %1055 = vmatpush.bf16.msrb.mxu3 %v2594_v61  ;;  %1069 = vmatpush.bf16.msra.mxu0 %v2598_v62  ;;  %v3215_v61 = vld [vmem:[%s4235_s12 + $0x1a8] sm:$0xff]  ;;  %v3197_v62 = vld [vmem:[%s4235_s12 + $0x118] sm:$0xff] }
 0x5f4   :  { %2619 = vmatmul.msk.bf16.vlgmr.msra.gmra.mxu1 %vm70_vm0, %v3728_v58  ;;  %2620 = vmatmul.msk.bf16.vlgmr.msra.gmra.mxu2 %vm70_vm0, %v3728_v58 }
 0x5f5   :  { %2621 = vmatmul.msk.bf16.vlgmr.msra.gmra.mxu3 %vm70_vm0, %v3728_v58  ;;  %2622 = vmatmul.msk.bf16.vlgmr.msrb.gmra.mxu0 %vm70_vm0, %v3728_v58 }
 0x5f6   :  { %1083 = vmatpush.bf16.msra.mxu1 %v2602_v7  ;;  %1097 = vmatpush.bf16.msra.mxu2 %v2606_v8  ;;  %v3219_v7 = vld [vmem:[%s4235_s12 + $0x1c8] sm:$0xff]  ;;  %v3204_v8 = vld [vmem:[%s4235_s12 + $0x150] sm:$0xff] }
 0x5f7   :  { %1111 = vmatpush.bf16.msra.mxu3 %v2610_v9  ;;  %1125 = vmatpush.bf16.msrb.mxu0 %v2614_v10  ;;  %v3212_v9 = vld [vmem:[%s4235_s12 + $0x190] sm:$0xff]  ;;  %v3194_v10 = vld [vmem:[%s4235_s12 + $0x100] sm:$0xff] }
 0x604   :  { %2623 = vmatmul.msk.bf16.vlgmr.msrb.gmra.mxu1 %vm70_vm0, %v3728_v58  ;;  %2624 = vmatmul.msk.bf16.vlgmr.msrb.gmra.mxu2 %vm70_vm0, %v3728_v58 }
 0x605   :  { %2625 = vmatmul.msk.bf16.vlgmr.msrb.gmra.mxu3 %vm70_vm0, %v3728_v58  ;;  %2626 = vmatmul.msk.bf16.vlgmr.msra.gmra.mxu0 %vm70_vm0, %v3728_v58 }
 0x606   :  { %2208 = vmatpush.bf16.msrb.mxu1 %v3169_v11  ;;  %2250 = vmatpush.bf16.msra.mxu0 %v3193_v14  ;;  %v3218_v11 = vld [vmem:[%s4235_s12 + $0x1c0] sm:$0xff]  ;;  %v3203_v14 = vld [vmem:[%s4235_s12 + $0x148] sm:$0xff] }
 0x607   :  { %2222 = vmatpush.bf16.msrb.mxu2 %v3177_v15  ;;  %2236 = vmatpush.bf16.msrb.mxu3 %v3185_v16  ;;  %v3211_v15 = vld [vmem:[%s4235_s12 + $0x188] sm:$0xff]  ;;  %v3202_v16 = vld [vmem:[%s4235_s12 + $0x140] sm:$0xff] }
 0x60a   :  { %2209 = vmatpush.bf16.msrb.mxu1 %v3168_v17  ;;  %2251 = vmatpush.bf16.msra.mxu0 %v3192_v18  ;;  %v3210_v17 = vld [vmem:[%s4235_s12 + $0x180] sm:$0xff] }
 0x60b   :  { %2223 = vmatpush.bf16.msrb.mxu2 %v3176_v19  ;;  %2237 = vmatpush.bf16.msrb.mxu3 %v3184_v20  ;;  %v3981_v18 = vld [vmem:[%s4234_s11] sm:$0xff] }
 0x60e   :  { %2210 = vmatpush.bf16.msrb.mxu1 %v3167_v22  ;;  %2252 = vmatpush.bf16.msra.mxu0 %v3191_v23  ;;  %v793_v22 = vperm.slane %v3981_v18, 0  ;;  %v796_v23 = vperm.slane %v3981_v18, 3 }
 0x60f   :  { %2224 = vmatpush.bf16.msrb.mxu2 %v3175_v24  ;;  %2238 = vmatpush.bf16.msrb.mxu3 %v3183_v25 }
 0x612   :  { %2211 = vmatpush.bf16.msrb.mxu1 %v3166_v26  ;;  %2253 = vmatpush.bf16.msra.mxu0 %v3190_v27 }
 0x613   :  { %2225 = vmatpush.bf16.msrb.mxu2 %v3174_v28  ;;  %2239 = vmatpush.bf16.msrb.mxu3 %v3182_v29  ;;  %v794_v29 = vperm.slane %v3981_v18, 1 }
 0x614   :  { %2627 = vmatmul.msk.bf16.vlgmr.msra.gmra.mxu1 %vm70_vm0, %v3728_v58  ;;  %2628 = vmatmul.msk.bf16.vlgmr.msra.gmra.mxu2 %vm70_vm0, %v3728_v58 }
 0x615   :  { %2629 = vmatmul.msk.bf16.vlgmr.msra.gmra.mxu3 %vm70_vm0, %v3728_v58  ;;  %2630 = vmatmul.msk.bf16.vlgmr.msrb.gmra.mxu0 %vm70_vm0, %v3728_v58  ;;  %v3198_v58 = vld [vmem:[%s4235_s12 + $0x120] sm:$0xff] }
 0x616   :  { %2212 = vmatpush.bf16.msrb.mxu1 %v3165_v30  ;;  %2254 = vmatpush.bf16.msra.mxu0 %v3189_v31 }
 0x617   :  { %2226 = vmatpush.bf16.msrb.mxu2 %v3173_v32  ;;  %2240 = vmatpush.bf16.msrb.mxu3 %v3181_v33  ;;  %v795_v32 = vperm.slane %v3981_v18, 2 }
 0x61a   :  { %2213 = vmatpush.bf16.msrb.mxu1 %v3164_v34  ;;  %2255 = vmatpush.bf16.msra.mxu0 %v3188_v35 }
 0x61b   :  { %2227 = vmatpush.bf16.msrb.mxu2 %v3172_v36  ;;  %2241 = vmatpush.bf16.msrb.mxu3 %v3180_v37 }
 0x61e   :  { %2214 = vmatpush.bf16.msrb.mxu1 %v3163_v38  ;;  %2256 = vmatpush.bf16.msra.mxu0 %v3187_v39  ;;  %v3233_v38 = vld [vmem:[%s4235_s12 + $0x238] sm:$0xff] }
 0x61f   :  { %2228 = vmatpush.bf16.msrb.mxu2 %v3171_v40  ;;  %2242 = vmatpush.bf16.msrb.mxu3 %v3179_v41  ;;  %v3257_v41 = vld [vmem:[%s4235_s12 + $0x2f8] sm:$0xff] }
 0x622   :  { %2215 = vmatpush.bf16.msrb.mxu1 %v3162_v42  ;;  %2257 = vmatpush.bf16.msra.mxu0 %v3186_v43 }
 0x623   :  { %2229 = vmatpush.bf16.msrb.mxu2 %v3170_v46  ;;  %2243 = vmatpush.bf16.msrb.mxu3 %v3178_v21 }
 0x626   :  { %2264 = vmatpush.bf16.msra.mxu1 %v3201_v44  ;;  %2306 = vmatpush.bf16.msrb.mxu0 %v3225_v45 }
 0x627   :  { %2278 = vmatpush.bf16.msra.mxu2 %v3209_v47  ;;  %2292 = vmatpush.bf16.msra.mxu3 %v3217_v49  ;;  %v3232_v49 = vld [vmem:[%s4235_s12 + $0x230] sm:$0xff] }
 0x62a   :  { %2265 = vmatpush.bf16.msra.mxu1 %v3200_v50  ;;  %2307 = vmatpush.bf16.msrb.mxu0 %v3224_v51 }
 0x62b   :  { %2279 = vmatpush.bf16.msra.mxu2 %v3208_v52  ;;  %2293 = vmatpush.bf16.msra.mxu3 %v3216_v55  ;;  %v3256_v55 = vld [vmem:[%s4235_s12 + $0x2f0] sm:$0xff] }
 0x62e   :  { %2266 = vmatpush.bf16.msra.mxu1 %v3199_v56  ;;  %2308 = vmatpush.bf16.msrb.mxu0 %v3223_v57 }
 0x62f   :  { %2280 = vmatpush.bf16.msra.mxu2 %v3207_v60  ;;  %2294 = vmatpush.bf16.msra.mxu3 %v3215_v61  ;;  %v797_v60 = vperm.slane %v3981_v18, 4  ;;  %v3249_v61 = vld [vmem:[%s4235_s12 + $0x2b8] sm:$0xff] }
 0x632   :  { %2267 = vmatpush.bf16.msra.mxu1 %v3198_v58  ;;  %2309 = vmatpush.bf16.msrb.mxu0 %v3222_v59  ;;  %v3241_v58 = vld [vmem:[%s4235_s12 + $0x278] sm:$0xff] }
 0x633   :  { %2281 = vmatpush.bf16.msra.mxu2 %v3206_v0  ;;  %2295 = vmatpush.bf16.msra.mxu3 %v3214_v1  ;;  %v3231_v0 = vld [vmem:[%s4235_s12 + $0x228] sm:$0xff] }
 0x634   :  { %v3255_v1 = vld [vmem:[%s4235_s12 + $0x2e8] sm:$0xff] }
 0x636   :  { %2268 = vmatpush.bf16.msra.mxu1 %v3197_v62  ;;  %2310 = vmatpush.bf16.msrb.mxu0 %v3221_v63  ;;  %v800_v63 = vperm.slane %v3981_v18, 7 }
 0x637   :  { %2282 = vmatpush.bf16.msra.mxu2 %v3205_v4  ;;  %2296 = vmatpush.bf16.msra.mxu3 %v3213_v5 }
 0x63a   :  { %2269 = vmatpush.bf16.msra.mxu1 %v3196_v2  ;;  %2311 = vmatpush.bf16.msrb.mxu0 %v3220_v3  ;;  %v3240_v3 = vld [vmem:[%s4235_s12 + $0x270] sm:$0xff] }
 0x63b   :  { %2283 = vmatpush.bf16.msra.mxu2 %v3204_v8  ;;  %2297 = vmatpush.bf16.msra.mxu3 %v3212_v9  ;;  %v3230_v9 = vld [vmem:[%s4235_s12 + $0x220] sm:$0xff] }
 0x63e   :  { %2270 = vmatpush.bf16.msra.mxu1 %v3195_v6  ;;  %2312 = vmatpush.bf16.msrb.mxu0 %v3219_v7  ;;  %v3248_v6 = vld [vmem:[%s4235_s12 + $0x2b0] sm:$0xff] }
 0x63f   :  { %2284 = vmatpush.bf16.msra.mxu2 %v3203_v14  ;;  %2298 = vmatpush.bf16.msra.mxu3 %v3211_v15  ;;  %v3254_v15 = vld [vmem:[%s4235_s12 + $0x2e0] sm:$0xff] }
 0x642   :  { %2271 = vmatpush.bf16.msra.mxu1 %v3194_v10  ;;  %2313 = vmatpush.bf16.msrb.mxu0 %v3218_v11  ;;  %v798_v10 = vperm.slane %v3981_v18, 5 }
 0x643   :  { %2285 = vmatpush.bf16.msra.mxu2 %v3202_v16  ;;  %2299 = vmatpush.bf16.msra.mxu3 %v3210_v17  ;;  %v799_v16 = vperm.slane %v3981_v18, 6  ;;  %v3229_v18 = vld [vmem:[%s4235_s12 + $0x218] sm:$0xff] }
 0x661   :  { %v917_v19 = vpop.f32.mrf.mxu1 }
 0x662   :  { %v959_v20 = vpop.f32.mrf.mxu0  ;;  %v918_v25 = vadd.f32 %v917_v19, %v793_v22  ;;  %v3239_v19 = vld [vmem:[%s4235_s12 + $0x268] sm:$0xff] }
 0x663   :  { %v960_v27 = vadd.f32 %v959_v20, %v796_v23 }
 0x664   :  { %v1132_v34 = vmax.f32 %v918_v25, 0.0 }
 0x665   :  { %v1135_v36 = vmax.f32 %v960_v27, 0.0 }
 0x667   :  { %v931_v24 = vpop.f32.mrf.mxu2 }
 0x668   :  { %v945_v26 = vpop.f32.mrf.mxu3  ;;  %v932_v39 = vadd.f32 %v931_v24, %v794_v29 }
 0x669   :  { %v919_v28 = vpop.f32.mrf.mxu1  ;;  %v946_v42 = vadd.f32 %v945_v26, %v795_v32 }
 0x66a   :  { %v920_v30 = vadd.f32 %v919_v28, %v793_v22  ;;  %v961_v31 = vpop.f32.mrf.mxu0  ;;  %v1133_v50 = vmax.f32 %v932_v39, 0.0  ;;  %v3253_v28 = vld [vmem:[%s4235_s12 + $0x2d8] sm:$0xff]  ;;  %v3228_v39 = vld [vmem:[%s4235_s12 + $0x210] sm:$0xff] }
 0x66b   :  { %v962_v33 = vadd.f32 %v961_v31, %v796_v23  ;;  %v1134_v56 = vmax.f32 %v946_v42, 0.0  ;;  %v3247_v23 = vld [vmem:[%s4235_s12 + $0x2a8] sm:$0xff] }
 0x66c   :  { %v1148_v35 = vmax.f32 %v920_v30, 0.0 }
 0x66d   :  { %v1151_v37 = vmax.f32 %v962_v33, 0.0 }
 0x66e   :  { %v1164_v40 = vpack.c.bf16 %v1148_v35, %v1132_v34  ;;  %v3246_v35 = vld [vmem:[%s4235_s12 + $0x2a0] sm:$0xff] }
 0x66f   :  { %v1167_v43 = vpack.c.bf16 %v1151_v37, %v1135_v36  ;;  %v933_v44 = vpop.f32.mrf.mxu2  ;;  %v4048_v37 = vld [vmem:[%s4234_s11 + $0x8] sm:$0xff] }
 0x670   :  { %v934_v45 = vadd.f32 %v933_v44, %v794_v29  ;;  %v947_v46 = vpop.f32.mrf.mxu3  ;;  %2216 = vmatmul.bf16.vlgmr.msrb.gmra.mxu1 %v1164_v40 }
 0x671   :  { %v948_v21 = vadd.f32 %v947_v46, %v795_v32  ;;  %2258 = vmatmul.bf16.vlgmr.msra.gmra.mxu0 %v1167_v43  ;;  %2320 = vmatpush.bf16.msrb.mxu1 %v3233_v38  ;;  %v973_v47 = vpop.f32.mrf.mxu1  ;;  %v3238_v32 = vld [vmem:[%s4235_s12 + $0x260] sm:$0xff]  ;;  %v3252_v43 = vld [vmem:[%s4235_s12 + $0x2d0] sm:$0xff]  ;;  %v3237_v46 = vld [vmem:[%s4235_s12 + $0x258] sm:$0xff] }
 0x672   :  { %v1149_v51 = vmax.f32 %v934_v45, 0.0  ;;  %2362 = vmatpush.bf16.msra.mxu0 %v3257_v41  ;;  %v1015_v52 = vpop.f32.mrf.mxu0  ;;  %v974_v4 = vadd.f32 %v973_v47, %v797_v60  ;;  %v801_v47 = vperm.slane %v4048_v37, 0 }
 0x673   :  { %v1150_v57 = vmax.f32 %v948_v21, 0.0  ;;  %v1016_v7 = vadd.f32 %v1015_v52, %v800_v63  ;;  %v3227_v52 = vld [vmem:[%s4235_s12 + $0x208] sm:$0xff] }
 0x674   :  { %v1165_v59 = vpack.c.bf16 %v1149_v51, %v1133_v50  ;;  %v1136_v20 = vmax.f32 %v974_v4, 0.0  ;;  %v804_v51 = vperm.slane %v4048_v37, 3  ;;  %v3265_v4 = vld [vmem:[%s4235_s12 + $0x338] sm:$0xff] }
 0x675   :  { %v1166_v62 = vpack.c.bf16 %v1150_v57, %v1134_v56  ;;  %2321 = vmatpush.bf16.msrb.mxu1 %v3232_v49  ;;  %v1139_v24 = vmax.f32 %v1016_v7, 0.0  ;;  %v3245_v49 = vld [vmem:[%s4235_s12 + $0x298] sm:$0xff]  ;;  %v3236_v57 = vld [vmem:[%s4235_s12 + $0x250] sm:$0xff] }
 0x676   :  { %2363 = vmatpush.bf16.msra.mxu0 %v3256_v55  ;;  %2230 = vmatmul.bf16.vlgmr.msrb.gmra.mxu2 %v1165_v59  ;;  %v3251_v55 = vld [vmem:[%s4235_s12 + $0x2c8] sm:$0xff]  ;;  %v3289_v7 = vld [vmem:[%s4235_s12 + $0x3f8] sm:$0xff] }
 0x677   :  { %2244 = vmatmul.bf16.vlgmr.msrb.gmra.mxu3 %v1166_v62  ;;  %2334 = vmatpush.bf16.msrb.mxu2 %v3241_v58  ;;  %v987_v2 = vpop.f32.mrf.mxu2 }
 0x678   :  { %2348 = vmatpush.bf16.msrb.mxu3 %v3249_v61  ;;  %v1001_v5 = vpop.f32.mrf.mxu3  ;;  %v988_v26 = vadd.f32 %v987_v2, %v798_v10 }
 0x679   :  { %2322 = vmatpush.bf16.msrb.mxu1 %v3231_v0  ;;  %v975_v8 = vpop.f32.mrf.mxu1  ;;  %v1002_v29 = vadd.f32 %v1001_v5, %v799_v16  ;;  %v802_v0 = vperm.slane %v4048_v37, 1  ;;  %v803_v5 = vperm.slane %v4048_v37, 2 }
 0x67a   :  { %2364 = vmatpush.bf16.msra.mxu0 %v3255_v1  ;;  %v976_v11 = vadd.f32 %v975_v8, %v797_v60  ;;  %v1017_v14 = vpop.f32.mrf.mxu0  ;;  %v1137_v40 = vmax.f32 %v988_v26, 0.0  ;;  %v3244_v60 = vld [vmem:[%s4235_s12 + $0x290] sm:$0xff]  ;;  %v3235_v8 = vld [vmem:[%s4235_s12 + $0x248] sm:$0xff] }
 0x67b   :  { %v1018_v17 = vadd.f32 %v1017_v14, %v800_v63  ;;  %2335 = vmatpush.bf16.msrb.mxu2 %v3240_v3  ;;  %v1138_v44 = vmax.f32 %v1002_v29, 0.0  ;;  %v3226_v63 = vld [vmem:[%s4235_s12 + $0x200] sm:$0xff] }
 0x67c   :  { %v1152_v22 = vmax.f32 %v976_v11, 0.0  ;;  %2349 = vmatpush.bf16.msrb.mxu3 %v3248_v6  ;;  %v3250_v3 = vld [vmem:[%s4235_s12 + $0x2c0] sm:$0xff]  ;;  %v3243_v11 = vld [vmem:[%s4235_s12 + $0x288] sm:$0xff] }
 0x67d   :  { %v1155_v25 = vmax.f32 %v1018_v17, 0.0  ;;  %2323 = vmatpush.bf16.msrb.mxu1 %v3230_v9 }
 0x67e   :  { %v1168_v27 = vpack.c.bf16 %v1152_v22, %v1136_v20  ;;  %2365 = vmatpush.bf16.msra.mxu0 %v3254_v15 }
 0x67f   :  { %v1171_v30 = vpack.c.bf16 %v1155_v25, %v1139_v24  ;;  %2336 = vmatpush.bf16.msrb.mxu2 %v3239_v19  ;;  %v989_v31 = vpop.f32.mrf.mxu2  ;;  %v3264_v19 = vld [vmem:[%s4235_s12 + $0x330] sm:$0xff]  ;;  %v3234_v25 = vld [vmem:[%s4235_s12 + $0x240] sm:$0xff] }
 0x680   :  { %2350 = vmatpush.bf16.msrb.mxu3 %v3247_v23  ;;  %v990_v33 = vadd.f32 %v989_v31, %v798_v10  ;;  %v1003_v34 = vpop.f32.mrf.mxu3  ;;  %2272 = vmatmul.bf16.vlgmr.msra.gmra.mxu1 %v1168_v27  ;;  %v3288_v24 = vld [vmem:[%s4235_s12 + $0x3f0] sm:$0xff]  ;;  %v3242_v27 = vld [vmem:[%s4235_s12 + $0x280] sm:$0xff] }
 0x681   :  { %v1004_v36 = vadd.f32 %v1003_v34, %v799_v16  ;;  %2314 = vmatmul.bf16.vlgmr.msrb.gmra.mxu0 %v1171_v30  ;;  %2324 = vmatpush.bf16.msrb.mxu1 %v3229_v18  ;;  %v1029_v38 = vpop.f32.mrf.mxu1  ;;  %v3281_v30 = vld [vmem:[%s4235_s12 + $0x3b8] sm:$0xff] }
 0x682   :  { %v1153_v41 = vmax.f32 %v990_v33, 0.0  ;;  %2366 = vmatpush.bf16.msra.mxu0 %v3253_v28  ;;  %v1071_v42 = vpop.f32.mrf.mxu0  ;;  %v1030_v58 = vadd.f32 %v1029_v38, %v801_v47  ;;  %v3273_v28 = vld [vmem:[%s4235_s12 + $0x378] sm:$0xff]  ;;  %v3263_v33 = vld [vmem:[%s4235_s12 + $0x328] sm:$0xff] }
 0x683   :  { %v1154_v45 = vmax.f32 %v1004_v36, 0.0  ;;  %2337 = vmatpush.bf16.msrb.mxu2 %v3238_v32  ;;  %v1072_v61 = vadd.f32 %v1071_v42, %v804_v51  ;;  %v3287_v36 = vld [vmem:[%s4235_s12 + $0x3e8] sm:$0xff] }
 0x684   :  { %v1169_v21 = vpack.c.bf16 %v1153_v41, %v1137_v40  ;;  %2351 = vmatpush.bf16.msrb.mxu3 %v3246_v35  ;;  %v1140_v9 = vmax.f32 %v1030_v58, 0.0  ;;  %v3280_v41 = vld [vmem:[%s4235_s12 + $0x3b0] sm:$0xff] }
 0x685   :  { %v1170_v50 = vpack.c.bf16 %v1154_v45, %v1138_v44  ;;  %2325 = vmatpush.bf16.msrb.mxu1 %v3228_v39  ;;  %v1143_v14 = vmax.f32 %v1072_v61, 0.0  ;;  %v3272_v39 = vld [vmem:[%s4235_s12 + $0x370] sm:$0xff]  ;;  %v3286_v45 = vld [vmem:[%s4235_s12 + $0x3e0] sm:$0xff] }
 0x686   :  { %2367 = vmatpush.bf16.msra.mxu0 %v3252_v43  ;;  %2286 = vmatmul.bf16.vlgmr.msra.gmra.mxu2 %v1169_v21  ;;  %v3262_v43 = vld [vmem:[%s4235_s12 + $0x320] sm:$0xff]  ;;  %v3279_v21 = vld [vmem:[%s4235_s12 + $0x3a8] sm:$0xff] }
 0x687   :  { %2300 = vmatmul.bf16.vlgmr.msra.gmra.mxu3 %v1170_v50  ;;  %2338 = vmatpush.bf16.msrb.mxu2 %v3237_v46  ;;  %v1043_v56 = vpop.f32.mrf.mxu2  ;;  %v3271_v46 = vld [vmem:[%s4235_s12 + $0x368] sm:$0xff] }
 0x688   :  { %2352 = vmatpush.bf16.msrb.mxu3 %v3245_v49  ;;  %v1057_v59 = vpop.f32.mrf.mxu3  ;;  %v1044_v16 = vadd.f32 %v1043_v56, %v802_v0  ;;  %v3285_v49 = vld [vmem:[%s4235_s12 + $0x3d8] sm:$0xff]  ;;  %v3260_v56 = vld [vmem:[%s4235_s12 + $0x310] sm:$0xff] }
 0x689   :  { %2326 = vmatpush.bf16.msrb.mxu1 %v3227_v52  ;;  %v1031_v62 = vpop.f32.mrf.mxu1  ;;  %v1058_v20 = vadd.f32 %v1057_v59, %v803_v5  ;;  %v3269_v59 = vld [vmem:[%s4235_s12 + $0x358] sm:$0xff] }
 0x68a   :  { %2368 = vmatpush.bf16.msra.mxu0 %v3251_v55  ;;  %v1032_v1 = vadd.f32 %v1031_v62, %v801_v47  ;;  %v1073_v2 = vpop.f32.mrf.mxu0  ;;  %v1141_v31 = vmax.f32 %v1044_v16, 0.0  ;;  %v3261_v47 = vld [vmem:[%s4235_s12 + $0x318] sm:$0xff]  ;;  %v3278_v55 = vld [vmem:[%s4235_s12 + $0x3a0] sm:$0xff]  ;;  %v807_v16 = vperm.slane %v4048_v37, 6 }
 0x68b   :  { %v1074_v6 = vadd.f32 %v1073_v2, %v804_v51  ;;  %2339 = vmatpush.bf16.msrb.mxu2 %v3236_v57  ;;  %v1142_v34 = vmax.f32 %v1058_v20, 0.0  ;;  %v3270_v51 = vld [vmem:[%s4235_s12 + $0x360] sm:$0xff]  ;;  %v3284_v57 = vld [vmem:[%s4235_s12 + $0x3d0] sm:$0xff]  ;;  %v3277_v62 = vld [vmem:[%s4235_s12 + $0x398] sm:$0xff] }
 0x68c   :  { %v1156_v10 = vmax.f32 %v1032_v1, 0.0  ;;  %2353 = vmatpush.bf16.msrb.mxu3 %v3244_v60  ;;  %v805_v60 = vperm.slane %v4048_v37, 4  ;;  %v3283_v2 = vld [vmem:[%s4235_s12 + $0x3c8] sm:$0xff] }
 0x68d   :  { %v1159_v15 = vmax.f32 %v1074_v6, 0.0  ;;  %2327 = vmatpush.bf16.msrb.mxu1 %v3226_v63  ;;  %v808_v63 = vperm.slane %v4048_v37, 7  ;;  %v3276_v6 = vld [vmem:[%s4235_s12 + $0x390] sm:$0xff] }
 0x68e   :  { %v1172_v17 = vpack.c.bf16 %v1156_v10, %v1140_v9  ;;  %2369 = vmatpush.bf16.msra.mxu0 %v3250_v3  ;;  %v3258_v9 = vld [vmem:[%s4235_s12 + $0x300] sm:$0xff]  ;;  %v806_v10 = vperm.slane %v4048_v37, 5 }
 0x68f   :  { %v1175_v22 = vpack.c.bf16 %v1159_v15, %v1143_v14  ;;  %2340 = vmatpush.bf16.msrb.mxu2 %v3235_v8  ;;  %v1045_v23 = vpop.f32.mrf.mxu2  ;;  %v3282_v15 = vld [vmem:[%s4235_s12 + $0x3c0] sm:$0xff] }
 0x690   :  { %2354 = vmatpush.bf16.msrb.mxu3 %v3243_v11  ;;  %v1046_v18 = vadd.f32 %v1045_v23, %v802_v0  ;;  %v1059_v26 = vpop.f32.mrf.mxu3  ;;  %2328 = vmatmul.bf16.vlgmr.msrb.gmra.mxu1 %v1172_v17  ;;  %v3259_v0 = vld [vmem:[%s4235_s12 + $0x308] sm:$0xff] }
 0x691   :  { %2376 = vmatpush.bf16.msra.mxu1 %v3265_v4  ;;  %v1060_v29 = vadd.f32 %v1059_v26, %v803_v5  ;;  %2370 = vmatmul.bf16.vlgmr.msra.gmra.mxu0 %v1175_v22  ;;  %v1085_v42 = vpop.f32.mrf.mxu1  ;;  %v3268_v4 = vld [vmem:[%s4235_s12 + $0x350] sm:$0xff]  ;;  %v3275_v23 = vld [vmem:[%s4235_s12 + $0x388] sm:$0xff] }
 0x692   :  { %2418 = vmatpush.bf16.msrb.mxu0 %v3289_v7  ;;  %v1157_v32 = vmax.f32 %v1046_v18, 0.0  ;;  %v1127_v44 = vpop.f32.mrf.mxu0  ;;  %v1086_v5 = vadd.f32 %v1085_v42, %v805_v60 }
 0x693   :  { %v1158_v35 = vmax.f32 %v1060_v29, 0.0  ;;  %2341 = vmatpush.bf16.msrb.mxu2 %v3234_v25  ;;  %v1128_v7 = vadd.f32 %v1127_v44, %v808_v63 }
 0x694   :  { %v1173_v38 = vpack.c.bf16 %v1157_v32, %v1141_v31  ;;  %2355 = vmatpush.bf16.msrb.mxu3 %v3242_v27  ;;  %v1144_v20 = vmax.f32 %v1086_v5, 0.0 }
 0x695   :  { %2377 = vmatpush.bf16.msra.mxu1 %v3264_v19  ;;  %v1174_v40 = vpack.c.bf16 %v1158_v35, %v1142_v34  ;;  %v3267_v19 = vld [vmem:[%s4235_s12 + $0x348] sm:$0xff] }
 0x696   :  { %2419 = vmatpush.bf16.msrb.mxu0 %v3288_v24  ;;  %2342 = vmatmul.bf16.vlgmr.msrb.gmra.mxu2 %v1173_v38  ;;  %v1147_v24 = vmax.f32 %v1128_v7, 0.0 }
 0x697   :  { %2390 = vmatpush.bf16.msra.mxu2 %v3273_v28  ;;  %2356 = vmatmul.bf16.vlgmr.msrb.gmra.mxu3 %v1174_v40  ;;  %v1099_v50 = vpop.f32.mrf.mxu2  ;;  %v3266_v28 = vld [vmem:[%s4235_s12 + $0x340] sm:$0xff] }
 0x698   :  { %2404 = vmatpush.bf16.msra.mxu3 %v3281_v30  ;;  %v1113_v52 = vpop.f32.mrf.mxu3  ;;  %v1100_v18 = vadd.f32 %v1099_v50, %v806_v10  ;;  %v3274_v30 = vld [vmem:[%s4235_s12 + $0x380] sm:$0xff] }
 0x699   :  { %2378 = vmatpush.bf16.msra.mxu1 %v3263_v33  ;;  %v1087_v58 = vpop.f32.mrf.mxu1  ;;  %v1114_v37 = vadd.f32 %v1113_v52, %v807_v16 }
 0x69a   :  { %2420 = vmatpush.bf16.msrb.mxu0 %v3287_v36  ;;  %v1129_v61 = vpop.f32.mrf.mxu0  ;;  %v1088_v1 = vadd.f32 %v1087_v58, %v805_v60  ;;  %v1145_v32 = vmax.f32 %v1100_v18, 0.0 }
 0x69b   :  { %2391 = vmatpush.bf16.msra.mxu2 %v3272_v39  ;;  %v1130_v3 = vadd.f32 %v1129_v61, %v808_v63  ;;  %v1146_v33 = vmax.f32 %v1114_v37, 0.0 }
 0x69c   :  { %2405 = vmatpush.bf16.msra.mxu3 %v3280_v41  ;;  %v1160_v11 = vmax.f32 %v1088_v1, 0.0 }
 0x69d   :  { %2379 = vmatpush.bf16.msra.mxu1 %v3262_v43  ;;  %v1163_v17 = vmax.f32 %v1130_v3, 0.0 }
 0x69e   :  { %2421 = vmatpush.bf16.msrb.mxu0 %v3286_v45  ;;  %v1176_v26 = vpack.c.bf16 %v1160_v11, %v1144_v20  ;;  %v3347_v45 = vld [vmem:[%s4236_s13] ss:$0 sm:$0xff] }
 0x69f   :  { %2392 = vmatpush.bf16.msra.mxu2 %v3271_v46  ;;  %v1101_v8 = vpop.f32.mrf.mxu2  ;;  %v1179_v27 = vpack.c.bf16 %v1163_v17, %v1147_v24 }
 0x6a0   :  { %2406 = vmatpush.bf16.msra.mxu3 %v3279_v21  ;;  %v1115_v14 = vpop.f32.mrf.mxu3  ;;  %v1102_v22 = vadd.f32 %v1101_v8, %v806_v10 }
 0x6a1   :  { %2380 = vmatpush.bf16.msra.mxu1 %v3261_v47  ;;  %v1116_v25 = vadd.f32 %v1115_v14, %v807_v16 }
 0x6a2   :  { %2422 = vmatpush.bf16.msrb.mxu0 %v3285_v49  ;;  %v1161_v29 = vmax.f32 %v1102_v22, 0.0 }
 0x6a3   :  { %2393 = vmatpush.bf16.msra.mxu2 %v3270_v51  ;;  %v1162_v31 = vmax.f32 %v1116_v25, 0.0 }
 0x6a4   :  { %2407 = vmatpush.bf16.msra.mxu3 %v3278_v55  ;;  %v1177_v34 = vpack.c.bf16 %v1161_v29, %v1145_v32 }
 0x6a5   :  { %2381 = vmatpush.bf16.msra.mxu1 %v3260_v56  ;;  %v1178_v35 = vpack.c.bf16 %v1162_v31, %v1146_v33 }
 0x6a6   :  { %2423 = vmatpush.bf16.msrb.mxu0 %v3284_v57 }
 0x6a7   :  { %2394 = vmatpush.bf16.msra.mxu2 %v3269_v59 }
 0x6a8   :  { %2408 = vmatpush.bf16.msra.mxu3 %v3277_v62 }
 0x6a9   :  { %2382 = vmatpush.bf16.msra.mxu1 %v3259_v0 }
 0x6aa   :  { %2424 = vmatpush.bf16.msrb.mxu0 %v3283_v2 }
 0x6ab   :  { %2395 = vmatpush.bf16.msra.mxu2 %v3268_v4 }
 0x6ac   :  { %2409 = vmatpush.bf16.msra.mxu3 %v3276_v6 }
 0x6ad   :  { %2383 = vmatpush.bf16.msra.mxu1 %v3258_v9 }
 0x6ae   :  { %2425 = vmatpush.bf16.msrb.mxu0 %v3282_v15 }
 0x6af   :  { %2396 = vmatpush.bf16.msra.mxu2 %v3267_v19 }
 0x6b0   :  { %2410 = vmatpush.bf16.msra.mxu3 %v3275_v23  ;;  %2384 = vmatmul.bf16.vlgmr.msra.gmra.mxu1 %v1176_v26 }
 0x6b1   :  { %2426 = vmatmul.bf16.vlgmr.msrb.gmra.mxu0 %v1179_v27 }
 0x6b3   :  { %2397 = vmatpush.bf16.msra.mxu2 %v3266_v28 }
 0x6b4   :  { %2411 = vmatpush.bf16.msra.mxu3 %v3274_v30 }
 0x6b6   :  { %2398 = vmatmul.bf16.vlgmr.msra.gmra.mxu2 %v1177_v34 }
 0x6b7   :  { %2412 = vmatmul.bf16.vlgmr.msra.gmra.mxu3 %v1178_v35 }
 0x6ed   :  { %v2217_v36 = vpop.f32.mrf.mxu1 }
 0x6ee   :  { %v2259_v40 = vpop.f32.mrf.mxu0  ;;  %v2218_v21 = vadd.f32 %v3347_v45, %v2217_v36 }
 0x6f5   :  { %v2219_v41 = vpop.f32.mrf.mxu1 }
 0x6f6   :  { %v2261_v44 = vpop.f32.mrf.mxu0  ;;  %v2220_v56 = vadd.f32 %v3347_v45, %v2219_v41 }
 0x6f9   :  { %v2231_v38 = vpop.f32.mrf.mxu2 }
 0x6fa   :  { %v2245_v39 = vpop.f32.mrf.mxu3  ;;  %v2232_v47 = vadd.f32 %v2231_v38, %v2218_v21 }
 0x6fc   :  { %v2246_v52 = vadd.f32 %v2245_v39, %v2232_v47 }
 0x6fd   :  { %v2273_v46 = vpop.f32.mrf.mxu1 }
 0x6fe   :  { %v2315_v51 = vpop.f32.mrf.mxu0  ;;  %v2260_v57 = vadd.f32 %v2259_v40, %v2246_v52 }
 0x700   :  { %v2274_v60 = vadd.f32 %v2273_v46, %v2260_v57 }
 0x701   :  { %v2233_v42 = vpop.f32.mrf.mxu2 }
 0x702   :  { %v2247_v43 = vpop.f32.mrf.mxu3  ;;  %v2234_v58 = vadd.f32 %v2233_v42, %v2220_v56 }
 0x704   :  { %v2248_v61 = vadd.f32 %v2247_v43, %v2234_v58 }
 0x705   :  { %v2275_v55 = vpop.f32.mrf.mxu1 }
 0x706   :  { %v2317_v63 = vpop.f32.mrf.mxu0  ;;  %v2262_v2 = vadd.f32 %v2261_v44, %v2248_v61 }
 0x708   :  { %v2276_v4 = vadd.f32 %v2275_v55, %v2262_v2 }
 0x709   :  { %v2287_v49 = vpop.f32.mrf.mxu2 }
 0x70a   :  { %v2301_v50 = vpop.f32.mrf.mxu3  ;;  %v2288_v0 = vadd.f32 %v2287_v49, %v2274_v60 }
 0x70c   :  { %v2302_v3 = vadd.f32 %v2301_v50, %v2288_v0 }
 0x70d   :  { %v2329_v1 = vpop.f32.mrf.mxu1 }
 0x70e   :  { %v2316_v6 = vadd.f32 %v2315_v51, %v2302_v3  ;;  %v2371_v9 = vpop.f32.mrf.mxu0 }
 0x710   :  { %v2330_v11 = vadd.f32 %v2329_v1, %v2316_v6 }
 0x711   :  { %v2289_v59 = vpop.f32.mrf.mxu2 }
 0x712   :  { %v2303_v62 = vpop.f32.mrf.mxu3  ;;  %v2290_v7 = vadd.f32 %v2289_v59, %v2276_v4 }
 0x714   :  { %v2304_v14 = vadd.f32 %v2303_v62, %v2290_v7  ;;  %v3348_v7 = vld [vmem:[%s4237_s14] ss:$0 sm:$0xff]  ;;  %s3433_s14 = smov [#allocation2]  }
 0x715   :  { %v2331_v10 = vpop.f32.mrf.mxu1  ;;  %s2498_s6 = sshll.u32 %s3433_s14, 4  ;;  %s2499_s6 = int_to_ptr.vmem [resolvable:$true] %s2498_s6 }
 0x716   :  { %v2318_v16 = vadd.f32 %v2317_v63, %v2304_v14  ;;  %v2373_v22 = vpop.f32.mrf.mxu0 }
 0x718   :  { %v2332_v24 = vadd.f32 %v2331_v10, %v2318_v16 }
 0x719   :  { %v2343_v5 = vpop.f32.mrf.mxu2 }
 0x71a   :  { %v2357_v8 = vpop.f32.mrf.mxu3  ;;  %v2344_v15 = vadd.f32 %v2343_v5, %v2330_v11 }
 0x71c   :  { %v2358_v19 = vadd.f32 %v2357_v8, %v2344_v15 }
 0x71e   :  { %v2372_v18 = vadd.f32 %v2371_v9, %v2358_v19 }
 0x721   :  { %v2345_v17 = vpop.f32.mrf.mxu2 }
 0x722   :  { %v2359_v20 = vpop.f32.mrf.mxu3  ;;  %v2346_v25 = vadd.f32 %v2345_v17, %v2332_v24 }
 0x724   :  { %v2360_v27 = vadd.f32 %v2359_v20, %v2346_v25 }
 0x726   :  { %v2374_v33 = vadd.f32 %v2373_v22, %v2360_v27 }
 0x72d   :  { %v2385_v23 = vpop.f32.mrf.mxu1 }
 0x72e   :  { %v2386_v26 = vadd.f32 %v2385_v23, %v2372_v18  ;;  %v2427_v30 = vpop.f32.mrf.mxu0 }
 0x735   :  { %v2387_v32 = vpop.f32.mrf.mxu1 }
 0x736   :  { %v2388_v35 = vadd.f32 %v2387_v32, %v2374_v33  ;;  %v2429_v43 = vpop.f32.mrf.mxu0 }
 0x739   :  { %v2399_v37 = vpop.f32.mrf.mxu2 }
 0x73a   :  { %v2400_v28 = vadd.f32 %v2399_v37, %v2386_v26  ;;  %v2413_v29 = vpop.f32.mrf.mxu3 }
 0x73c   :  { %v2414_v31 = vadd.f32 %v2413_v29, %v2400_v28 }
 0x73e   :  { %v2428_v34 = vadd.f32 %v2427_v30, %v2414_v31 }
 0x740   :  { %v2432_v36 = vadd.f32 %v2428_v34, %v3713_v53 }
 0x741   :  { %v2401_v38 = vpop.f32.mrf.mxu2 }
 0x742   :  { %v2402_v39 = vadd.f32 %v2401_v38, %v2388_v35  ;;  %v2436_v40 = vsel %vm70_vm0, %v2432_v36, 0.0  ;;  %v2415_v41 = vpop.f32.mrf.mxu3 }
 0x743   :  { %2437 = vadd.xlane.f32.xlu1 %v2436_v40 }
 0x744   :  { %v2416_v42 = vadd.f32 %v2415_v41, %v2402_v39 }
 0x746   :  { %v2430_v44 = vadd.f32 %v2429_v43, %v2416_v42 }
 0x748   :  { %v2433_v45 = vadd.f32 %v2430_v44, %v3715_v54 }
 0x74a   :  { %v2439_v46 = vsel %vm70_vm0, %v2433_v45, 0.0 }
 0x74b   :  { %2440 = vadd.xlane.f32.xlu0 %v2439_v46 }
 0x7b6   :  { %v2438_v21 = vpop.xlane.xlu1 %2437 }
 0x7b7   :  { %v2442_v47 = vmul.f32 %v2438_v21, %v3626_v48 }
 0x7b9   :  { %v2444_v49 = vsub.f32 %v2432_v36, %v2442_v47 }
 0x7bb   :  { %v2446_v50 = vmul.f32 %v2444_v49, %v2444_v49 }
 0x7bd   :  { %v2448_v53 = vsel %vm70_vm0, %v2446_v50, 0.0 }
 0x7be   :  { %v2441_v51 = vpop.xlane.xlu0 %2440  ;;  %2449 = vadd.xlane.f32.xlu2 %v2448_v53 }
 0x7bf   :  { %v2443_v52 = vmul.f32 %v2441_v51, %v3626_v48 }
 0x7c1   :  { %v2445_v55 = vsub.f32 %v2433_v45, %v2443_v52 }
 0x7c3   :  { %v2447_v56 = vmul.f32 %v2445_v55, %v2445_v55 }
 0x7c5   :  { %v2451_v57 = vsel %vm70_vm0, %v2447_v56, 0.0 }
 0x7c6   :  { %2452 = vadd.xlane.f32.xlu1 %v2451_v57 }
 0x831   :  { %v2450_v54 = vpop.xlane.xlu2 %2449 }
 0x832   :  { %v2454_v58 = vmul.f32 %v2450_v54, %v3626_v48 }
 0x834   :  { %v2456_v59 = vadd.f32 1e-05, %v2454_v58 }
 0x836   :  { %3388 = vrsqrt.f32 %v2456_v59  ;;  %vm2464_vm12 = vweird.f32 %v2456_v59 }
 0x839   :  { %v2453_v60 = vpop.xlane.xlu1 %2452 }
 0x83a   :  { %v2455_v61 = vmul.f32 %v2453_v60, %v3626_v48  ;;  %v3349_v48 = vld [vmem:[%s4238_s15] ss:$0 sm:$0xff] }
 0x83c   :  { %v3389_v62 = vpop.eup %3388  ;;  %v2457_v63 = vadd.f32 1e-05, %v2455_v61 }
 0x83d   :  { %v2459_v0 = vmul.f32 %v3389_v62, %v2456_v59  ;;  %vm2465_vm11 = vweird.f32 %v3389_v62 }
 0x83e   :  { %3390 = vrsqrt.f32 %v2457_v63  ;;  %vm2466_vm13 = vmor %vm2464_vm12, %vm2465_vm11  ;;  %vm2474_vm15 = vweird.f32 %v2457_v63 }
 0x83f   :  { %v2460_v1 = vmul.f32 %v3389_v62, %v2459_v0 }
 0x841   :  { %v2461_v2 = vmul.f32 0.5, %v2460_v1 }
 0x843   :  { %v2462_v3 = vsub.f32 1.5, %v2461_v2 }
 0x844   :  { %v3391_v4 = vpop.eup %3390 }
 0x845   :  { %v2463_v5 = vmul.f32 %v3389_v62, %v2462_v3  ;;  %v2469_v6 = vmul.f32 %v3391_v4, %v2457_v63  ;;  %vm2475_vm14 = vweird.f32 %v3391_v4 }
 0x846   :  { %vm2476_vm1 = vmor %vm2474_vm15, %vm2475_vm14 }
 0x847   :  { %v2467_v8 = vsel %vm2466_vm13, %v3389_v62, %v2463_v5  ;;  %v2470_v9 = vmul.f32 %v3391_v4, %v2469_v6 }
 0x848   :  { %v2478_v10 = vmul.f32 %v2467_v8, %v2444_v49 }
 0x849   :  { %v2471_v11 = vmul.f32 0.5, %v2470_v9 }
 0x84a   :  { %v2483_v14 = vmul.f32 %v3348_v7, %v2478_v10 }
 0x84b   :  { %v2472_v15 = vsub.f32 1.5, %v2471_v11 }
 0x84c   :  { %v2488_v16 = vadd.f32 %v3349_v48, %v2483_v14 }
 0x84d   :  { %v2473_v17 = vmul.f32 %v3391_v4, %v2472_v15 }
 0x84e   :  { %v2490_v19 = vadd.f32 %v2488_v16, %v3542_v12 }
 0x84f   :  { %v2477_v20 = vsel %vm2476_vm1, %v3391_v4, %v2473_v17 }
 0x850   :  { %v2479_v22 = vmul.f32 %v2477_v20, %v2445_v55  ;;  %2492 = vst.msk [vmem:[#allocation2] sm:$0xff] %vm70_vm0, %v2490_v19 }
 0x852   :  { %v2484_v23 = vmul.f32 %v3348_v7, %v2479_v22 }
 0x854   :  { %v2489_v24 = vadd.f32 %v3349_v48, %v2484_v23 }
 0x856   :  { %v2491_v25 = vadd.f32 %v2489_v24, %v3544_v13 }
 0x858   :  { %2493 = vst.msk [vmem:[#allocation2 + $0x8] sm:$0xff] %vm70_vm0, %v2491_v25 }
 0x859   :  { %2506 = dma.vmem_to_hbm [thread:$0]  %s2499_s6, 256, %s2501_s7, [#allocation3], %s3434_s9, %s3434_s9, %s3430_s2  }
 0x85a   :  { %3416 = dma.done.wait [#allocation3], 256  }
 0x85b   :  { %3417 = vsyncadd [#allocation3], 4294967040 }
 0x85c   :  { %2511 = vsyncpa [#allocation3], 1 }

</bundles_post_ra>
